<compile_context>
chip_gen: v7x
topology: tpu7x:2x2x1
jax: 0.10.0
libtpu: 0.0.40
codegen_flags: <defaults>
</compile_context>

<pallas_src>
import jax
import jax.numpy as jnp
from jax.experimental import pallas as pl
from jax.experimental.pallas import tpu as pltpu


def autoencoder_kernel(x_ref,
                       w1, b1, w2, b2, w3, b3,   # encoder
                       w4, b4, w5, b5, w6, b6,   # decoder
                       out_ref):
    """Fused 6-layer MLP for one batch tile: bf16 MXU matmuls (f32 acc), f32 bias+ReLU."""

    def lin(h_bf16, w_ref, b_ref):
        # bf16 x bf16 on the MXU, f32 accumulation; bias add stays f32.
        return jnp.dot(h_bf16, w_ref[...], preferred_element_type=jnp.float32) + b_ref[...]

    def relu_bf16(acc_f32):
        # ReLU in f32 (VPU-safe on v5e), then a single cast to bf16 for the next layer's dot.
        return jnp.maximum(acc_f32, 0.0).astype(jnp.bfloat16)

    h = x_ref[...].astype(jnp.bfloat16)   # no-op when the streamed tile is already bf16
    # encoder
    h = relu_bf16(lin(h, w1, b1))
    h = relu_bf16(lin(h, w2, b2))
    h = relu_bf16(lin(h, w3, b3))
    # decoder
    h = relu_bf16(lin(h, w4, b4))
    h = relu_bf16(lin(h, w5, b5))
    # final layer: Linear only, no activation
    out_ref[...] = lin(h, w6, b6).astype(out_ref.dtype)


def _pick_tb(batch):
    """Enough grid steps for pipelining / megacore balance, taller tiles only for big batches."""
    if batch >= 8192:
        return 1024     # v5e/v6e: tall M amortizes per-step overhead; VMEM is nowhere near full
    if batch >= 4096:
        return 512
    if batch >= 1024:
        return 256
    return 128          # small B: keep >= ~4 grid steps so both v7x TensorCores stay busy


def _vmem_limit(needed_bytes):
    """Generation-aware scoped-VMEM limit: only raise past the default, never over-request."""
    phys = 128 << 20                 # v5e/v6e physical VMEM
    scoped_default = 16 << 20        # conservative (v5e scoped default)
    try:
        phys = int(pltpu.get_tpu_info().vmem_capacity_bytes)
    except Exception:
        pass
    if phys <= (64 << 20):           # v7x-class: 64 MiB physical, 32 MiB scoped default
        scoped_default = 32 << 20
    if needed_bytes <= scoped_default:
        return None
    # Never set an explicit limit below v6e/v7x's 32 MiB default; leave ~15% physical headroom
    # for Mosaic internal scratch (matters on v7x's 64 MiB).
    return int(min(max(needed_bytes, 32 << 20), int(phys * 0.85)))


def autoencoder_forward(x, params, *, tb=None):
    """x: [B, in_dim]. params: list of 6 (W[in,out] bf16, b[1,out] f32). Returns bf16 [B, in_dim]."""
    B, in_dim = x.shape
    if tb is None:
        tb = _pick_tb(B)

    # bf16 streamed input: halves the dominant HBM read traffic.
    x = x.astype(jnp.bfloat16)

    # Pad batch to a multiple of the batch tile so every grid step is a full block.
    num_tiles = pl.cdiv(B, tb)
    Bp = num_tiles * tb
    if Bp != B:
        x = jnp.pad(x, ((0, Bp - B), (0, 0)))

    # Cost estimate: 2*M*K*N flops per layer; bytes = bf16 x tile + bf16 out tile + params.
    flops = 0
    bytes_accessed = Bp * in_dim * 2 * 2   # input + output, bf16
    param_bytes = 0
    for w, b in params:
        din, dout = w.shape
        flops += 2 * Bp * din * dout
        param_bytes += w.size * w.dtype.itemsize + b.size * b.dtype.itemsize
    bytes_accessed += param_bytes
    cost = pl.CostEstimate(flops=int(flops), transcendentals=0,
                           bytes_accessed=int(bytes_accessed))

    out_spec = pl.BlockSpec((tb, in_dim), lambda i: (i, 0))
    x_spec = pl.BlockSpec((tb, in_dim), lambda i: (i, 0))

    def run(single_buffer_params):
        flat = [x]
        in_specs = [x_spec]
        for w, b in params:
            if single_buffer_params:
                # Constant-index blocks gain nothing from double-buffering.
                w_spec = pl.BlockSpec(w.shape, lambda i: (0, 0), pipeline_mode=pl.Buffered(1))
                b_spec = pl.BlockSpec(b.shape, lambda i: (0, 0), pipeline_mode=pl.Buffered(1))
            else:
                w_spec = pl.BlockSpec(w.shape, lambda i: (0, 0))
                b_spec = pl.BlockSpec(b.shape, lambda i: (0, 0))
            flat += [w, b]
            in_specs += [w_spec, b_spec]

        # VMEM budget: double-buffered bf16 x/out tiles, resident params (1x or 2x), per-layer
        # bf16 intermediate activations, plus fixed headroom.
        tile_bytes = tb * in_dim * 2
        param_buf = 1 if single_buffer_params else 2
        act_bytes = 3 * tb * in_dim * 2
        needed = 4 * tile_bytes + param_buf * param_bytes + act_bytes + (2 << 20)

        compiler_params = pltpu.CompilerParams(
            dimension_semantics=("parallel",),   # megacore sharding on v7x; no-op on v5e/v6e
            vmem_limit_bytes=_vmem_limit(needed),
        )

        return pl.pallas_call(
            autoencoder_kernel,
            out_shape=jax.ShapeDtypeStruct((Bp, in_dim), jnp.bfloat16),
            grid_spec=pltpu.PrefetchScalarGridSpec(
                num_scalar_prefetch=0,
                grid=(num_tiles,),
                in_specs=in_specs,
                out_specs=out_spec,
            ),
            compiler_params=compiler_params,
            cost_estimate=cost,
        )(*flat)

    try:
        out = run(True)
    except Exception:
        # TODO(synk): fallback for jax versions that reject single-buffered (Buffered(1)) blocks.
        out = run(False)
    return out[:B]


def init_params(key, in_dim, lat_dim):
    """Deterministic synthetic init (uniform, fan-in scaled). Weights bf16 [in,out], biases f32 [1,out]."""
    dims = [
        (in_dim, in_dim // 4),       # encoder.layer1
        (in_dim // 4, in_dim // 8),  # encoder.layer2
        (in_dim // 8, lat_dim),      # encoder.layer3
        (lat_dim, in_dim // 8),      # decoder.layerm3
        (in_dim // 8, in_dim // 4),  # decoder.layerm2
        (in_dim // 4, in_dim),       # decoder.layerm1
    ]
    params = []
    for (din, dout) in dims:
        key, kw, kb = jax.random.split(key, 3)
        bound = 1.0 / float(din) ** 0.5
        w = jax.random.uniform(kw, (din, dout), jnp.float32, -bound, bound).astype(jnp.bfloat16)
        b = jax.random.uniform(kb, (1, dout), jnp.float32, -bound, bound)
        params.append((w, b))
    return params


def reference_forward(x, params):
    """Plain-JAX reference with matching numerics: bf16 operands/activations, f32 accumulation."""
    h = x.astype(jnp.bfloat16)
    out = None
    for i, (w, b) in enumerate(params):
        acc = jnp.dot(h.astype(jnp.float32), w.astype(jnp.float32),
                      precision=jax.lax.Precision.HIGHEST) + b
        if i < len(params) - 1:
            h = jnp.maximum(acc, 0.0).astype(jnp.bfloat16)
        else:
            out = acc
    return out  # f32


if __name__ == "__main__":
    # Small shapes consistent with the module (in_dim divisible by 8).
    # B=500 is deliberately not a multiple of the tile; auto-picked TB=128 gives 4 grid steps.
    B, IN_DIM, LAT_DIM = 500, 256, 32

    key = jax.random.PRNGKey(0)
    key, kx = jax.random.split(key)
    x = jax.random.normal(kx, (B, IN_DIM), jnp.float32)

    params = init_params(key, IN_DIM, LAT_DIM)

    out = autoencoder_forward(x, params)
    out = jax.block_until_ready(out)

    ref = reference_forward(x, params)
    assert out.shape == (B, IN_DIM)
    assert out.dtype == jnp.bfloat16
    # Tolerance covers the bf16 rounding of the output store (outputs are O(0.1-1)).
    assert jnp.allclose(out.astype(jnp.float32), ref, atol=2e-2, rtol=2e-2), "mismatch vs reference"

    print("KERNEL_OK")
</pallas_src>

<mosaic_0001>
module attributes {stable_mosaic.version = 11 : i64} {
  func.func @autoencoder_kernel(%arg0: i32, %arg1: memref<128x256xbf16, #tpu.memory_space<vmem>>, %arg2: memref<256x64xbf16, #tpu.memory_space<vmem>>, %arg3: memref<1x64xf32, #tpu.memory_space<vmem>>, %arg4: memref<64x32xbf16, #tpu.memory_space<vmem>>, %arg5: memref<1x32xf32, #tpu.memory_space<vmem>>, %arg6: memref<32x32xbf16, #tpu.memory_space<vmem>>, %arg7: memref<1x32xf32, #tpu.memory_space<vmem>>, %arg8: memref<32x32xbf16, #tpu.memory_space<vmem>>, %arg9: memref<1x32xf32, #tpu.memory_space<vmem>>, %arg10: memref<32x64xbf16, #tpu.memory_space<vmem>>, %arg11: memref<1x64xf32, #tpu.memory_space<vmem>>, %arg12: memref<64x256xbf16, #tpu.memory_space<vmem>>, %arg13: memref<1x256xf32, #tpu.memory_space<vmem>>, %arg14: memref<128x256xbf16, #tpu.memory_space<vmem>>) attributes {dimension_semantics = [#tpu.dimension_semantics<parallel>], iteration_bounds = array<i64: 4>, scalar_prefetch = 0 : i64, scratch_operands = 0 : i64, tpu.core_type = #tpu.core_type<tc>, window_params = [{transform_indices = @transform_0, window_bounds = array<i64: 128, 256>}, {pipeline_mode = #tpu.pipeline_mode<synchronous>, transform_indices = @transform_1, window_bounds = array<i64: 256, 64>}, {pipeline_mode = #tpu.pipeline_mode<synchronous>, transform_indices = @transform_2, window_bounds = array<i64: 1, 64>}, {pipeline_mode = #tpu.pipeline_mode<synchronous>, transform_indices = @transform_3, window_bounds = array<i64: 64, 32>}, {pipeline_mode = #tpu.pipeline_mode<synchronous>, transform_indices = @transform_4, window_bounds = array<i64: 1, 32>}, {pipeline_mode = #tpu.pipeline_mode<synchronous>, transform_indices = @transform_5, window_bounds = array<i64: 32, 32>}, {pipeline_mode = #tpu.pipeline_mode<synchronous>, transform_indices = @transform_6, window_bounds = array<i64: 1, 32>}, {pipeline_mode = #tpu.pipeline_mode<synchronous>, transform_indices = @transform_7, window_bounds = array<i64: 32, 32>}, {pipeline_mode = #tpu.pipeline_mode<synchronous>, transform_indices = @transform_8, window_bounds = array<i64: 1, 32>}, {pipeline_mode = #tpu.pipeline_mode<synchronous>, transform_indices = @transform_9, window_bounds = array<i64: 32, 64>}, {pipeline_mode = #tpu.pipeline_mode<synchronous>, transform_indices = @transform_10, window_bounds = array<i64: 1, 64>}, {pipeline_mode = #tpu.pipeline_mode<synchronous>, transform_indices = @transform_11, window_bounds = array<i64: 64, 256>}, {pipeline_mode = #tpu.pipeline_mode<synchronous>, transform_indices = @transform_12, window_bounds = array<i64: 1, 256>}, {transform_indices = @transform_13, window_bounds = array<i64: 128, 256>}]} {
    %c0 = arith.constant 0 : index
    %c0_0 = arith.constant 0 : index
    %0 = vector.load %arg1[%c0, %c0_0] : memref<128x256xbf16, #tpu.memory_space<vmem>>, vector<128x256xbf16>
    %c0_1 = arith.constant 0 : index
    %c0_2 = arith.constant 0 : index
    %1 = vector.load %arg2[%c0_1, %c0_2] : memref<256x64xbf16, #tpu.memory_space<vmem>>, vector<256x64xbf16>
    %cst = arith.constant dense<0.000000e+00> : vector<128x64xf32>
    %2 = tpu.matmul %0, %1, %cst {dimension_numbers = #tpu.dot_dimension_numbers<[1], [0], [0], [1], [0, 0, 1, 1], [], []>} : vector<128x256xbf16>, vector<256x64xbf16>, vector<128x64xf32> -> vector<128x64xf32>
    %c0_3 = arith.constant 0 : index
    %c0_4 = arith.constant 0 : index
    %3 = vector.load %arg3[%c0_3, %c0_4] : memref<1x64xf32, #tpu.memory_space<vmem>>, vector<1x64xf32>
    %4 = vector.broadcast %3 : vector<1x64xf32> to vector<128x64xf32>
    %5 = arith.addf %2, %4 : vector<128x64xf32>
    %cst_5 = arith.constant 0.000000e+00 : f32
    %6 = vector.broadcast %cst_5 : f32 to vector<128x64xf32>
    %7 = arith.maximumf %5, %6 : vector<128x64xf32>
    %8 = arith.truncf %7 : vector<128x64xf32> to vector<128x64xbf16>
    %c0_6 = arith.constant 0 : index
    %c0_7 = arith.constant 0 : index
    %9 = vector.load %arg4[%c0_6, %c0_7] : memref<64x32xbf16, #tpu.memory_space<vmem>>, vector<64x32xbf16>
    %cst_8 = arith.constant dense<0.000000e+00> : vector<128x32xf32>
    %10 = tpu.matmul %8, %9, %cst_8 {dimension_numbers = #tpu.dot_dimension_numbers<[1], [0], [0], [1], [0, 0, 1, 1], [], []>} : vector<128x64xbf16>, vector<64x32xbf16>, vector<128x32xf32> -> vector<128x32xf32>
    %c0_9 = arith.constant 0 : index
    %c0_10 = arith.constant 0 : index
    %11 = vector.load %arg5[%c0_9, %c0_10] : memref<1x32xf32, #tpu.memory_space<vmem>>, vector<1x32xf32>
    %12 = vector.broadcast %11 : vector<1x32xf32> to vector<128x32xf32>
    %13 = arith.addf %10, %12 : vector<128x32xf32>
    %cst_11 = arith.constant 0.000000e+00 : f32
    %14 = vector.broadcast %cst_11 : f32 to vector<128x32xf32>
    %15 = arith.maximumf %13, %14 : vector<128x32xf32>
    %16 = arith.truncf %15 : vector<128x32xf32> to vector<128x32xbf16>
    %c0_12 = arith.constant 0 : index
    %c0_13 = arith.constant 0 : index
    %17 = vector.load %arg6[%c0_12, %c0_13] : memref<32x32xbf16, #tpu.memory_space<vmem>>, vector<32x32xbf16>
    %cst_14 = arith.constant dense<0.000000e+00> : vector<128x32xf32>
    %18 = tpu.matmul %16, %17, %cst_14 {dimension_numbers = #tpu.dot_dimension_numbers<[1], [0], [0], [1], [0, 0, 1, 1], [], []>} : vector<128x32xbf16>, vector<32x32xbf16>, vector<128x32xf32> -> vector<128x32xf32>
    %c0_15 = arith.constant 0 : index
    %c0_16 = arith.constant 0 : index
    %19 = vector.load %arg7[%c0_15, %c0_16] : memref<1x32xf32, #tpu.memory_space<vmem>>, vector<1x32xf32>
    %20 = vector.broadcast %19 : vector<1x32xf32> to vector<128x32xf32>
    %21 = arith.addf %18, %20 : vector<128x32xf32>
    %cst_17 = arith.constant 0.000000e+00 : f32
    %22 = vector.broadcast %cst_17 : f32 to vector<128x32xf32>
    %23 = arith.maximumf %21, %22 : vector<128x32xf32>
    %24 = arith.truncf %23 : vector<128x32xf32> to vector<128x32xbf16>
    %c0_18 = arith.constant 0 : index
    %c0_19 = arith.constant 0 : index
    %25 = vector.load %arg8[%c0_18, %c0_19] : memref<32x32xbf16, #tpu.memory_space<vmem>>, vector<32x32xbf16>
    %cst_20 = arith.constant dense<0.000000e+00> : vector<128x32xf32>
    %26 = tpu.matmul %24, %25, %cst_20 {dimension_numbers = #tpu.dot_dimension_numbers<[1], [0], [0], [1], [0, 0, 1, 1], [], []>} : vector<128x32xbf16>, vector<32x32xbf16>, vector<128x32xf32> -> vector<128x32xf32>
    %c0_21 = arith.constant 0 : index
    %c0_22 = arith.constant 0 : index
    %27 = vector.load %arg9[%c0_21, %c0_22] : memref<1x32xf32, #tpu.memory_space<vmem>>, vector<1x32xf32>
    %28 = vector.broadcast %27 : vector<1x32xf32> to vector<128x32xf32>
    %29 = arith.addf %26, %28 : vector<128x32xf32>
    %cst_23 = arith.constant 0.000000e+00 : f32
    %30 = vector.broadcast %cst_23 : f32 to vector<128x32xf32>
    %31 = arith.maximumf %29, %30 : vector<128x32xf32>
    %32 = arith.truncf %31 : vector<128x32xf32> to vector<128x32xbf16>
    %c0_24 = arith.constant 0 : index
    %c0_25 = arith.constant 0 : index
    %33 = vector.load %arg10[%c0_24, %c0_25] : memref<32x64xbf16, #tpu.memory_space<vmem>>, vector<32x64xbf16>
    %cst_26 = arith.constant dense<0.000000e+00> : vector<128x64xf32>
    %34 = tpu.matmul %32, %33, %cst_26 {dimension_numbers = #tpu.dot_dimension_numbers<[1], [0], [0], [1], [0, 0, 1, 1], [], []>} : vector<128x32xbf16>, vector<32x64xbf16>, vector<128x64xf32> -> vector<128x64xf32>
    %c0_27 = arith.constant 0 : index
    %c0_28 = arith.constant 0 : index
    %35 = vector.load %arg11[%c0_27, %c0_28] : memref<1x64xf32, #tpu.memory_space<vmem>>, vector<1x64xf32>
    %36 = vector.broadcast %35 : vector<1x64xf32> to vector<128x64xf32>
    %37 = arith.addf %34, %36 : vector<128x64xf32>
    %cst_29 = arith.constant 0.000000e+00 : f32
    %38 = vector.broadcast %cst_29 : f32 to vector<128x64xf32>
    %39 = arith.maximumf %37, %38 : vector<128x64xf32>
    %40 = arith.truncf %39 : vector<128x64xf32> to vector<128x64xbf16>
    %c0_30 = arith.constant 0 : index
    %c0_31 = arith.constant 0 : index
    %41 = vector.load %arg12[%c0_30, %c0_31] : memref<64x256xbf16, #tpu.memory_space<vmem>>, vector<64x256xbf16>
    %cst_32 = arith.constant dense<0.000000e+00> : vector<128x256xf32>
    %42 = tpu.matmul %40, %41, %cst_32 {dimension_numbers = #tpu.dot_dimension_numbers<[1], [0], [0], [1], [0, 0, 1, 1], [], []>} : vector<128x64xbf16>, vector<64x256xbf16>, vector<128x256xf32> -> vector<128x256xf32>
    %c0_33 = arith.constant 0 : index
    %c0_34 = arith.constant 0 : index
    %43 = vector.load %arg13[%c0_33, %c0_34] : memref<1x256xf32, #tpu.memory_space<vmem>>, vector<1x256xf32>
    %44 = vector.broadcast %43 : vector<1x256xf32> to vector<128x256xf32>
    %45 = arith.addf %42, %44 : vector<128x256xf32>
    %46 = arith.truncf %45 : vector<128x256xf32> to vector<128x256xbf16>
    %c0_35 = arith.constant 0 : index
    %c0_36 = arith.constant 0 : index
    %47 = vector.load %arg14[%c0_35, %c0_36] : memref<128x256xbf16, #tpu.memory_space<vmem>>, vector<128x256xbf16>
    tpu.vector_store %arg14[%c0_35, %c0_36], %46 {strides = array<i32>} : memref<128x256xbf16, #tpu.memory_space<vmem>>, vector<128x256xbf16>,
    return
  }
  func.func @transform_0(%arg0: i32) -> (i32, i32) {
    %c0_i32 = arith.constant 0 : i32
    %c0_i32_0 = arith.constant 0 : i32
    return %arg0, %c0_i32 : i32, i32
  }
  func.func @transform_1(%arg0: i32) -> (i32, i32) {
    %c0_i32 = arith.constant 0 : i32
    %c0_i32_0 = arith.constant 0 : i32
    %c0_i32_1 = arith.constant 0 : i32
    return %c0_i32, %c0_i32_0 : i32, i32
  }
  func.func @transform_2(%arg0: i32) -> (i32, i32) {
    %c0_i32 = arith.constant 0 : i32
    %c0_i32_0 = arith.constant 0 : i32
    %c0_i32_1 = arith.constant 0 : i32
    return %c0_i32, %c0_i32_0 : i32, i32
  }
  func.func @transform_3(%arg0: i32) -> (i32, i32) {
    %c0_i32 = arith.constant 0 : i32
    %c0_i32_0 = arith.constant 0 : i32
    %c0_i32_1 = arith.constant 0 : i32
    return %c0_i32, %c0_i32_0 : i32, i32
  }
  func.func @transform_4(%arg0: i32) -> (i32, i32) {
    %c0_i32 = arith.constant 0 : i32
    %c0_i32_0 = arith.constant 0 : i32
    %c0_i32_1 = arith.constant 0 : i32
    return %c0_i32, %c0_i32_0 : i32, i32
  }
  func.func @transform_5(%arg0: i32) -> (i32, i32) {
    %c0_i32 = arith.constant 0 : i32
    %c0_i32_0 = arith.constant 0 : i32
    %c0_i32_1 = arith.constant 0 : i32
    return %c0_i32, %c0_i32_0 : i32, i32
  }
  func.func @transform_6(%arg0: i32) -> (i32, i32) {
    %c0_i32 = arith.constant 0 : i32
    %c0_i32_0 = arith.constant 0 : i32
    %c0_i32_1 = arith.constant 0 : i32
    return %c0_i32, %c0_i32_0 : i32, i32
  }
  func.func @transform_7(%arg0: i32) -> (i32, i32) {
    %c0_i32 = arith.constant 0 : i32
    %c0_i32_0 = arith.constant 0 : i32
    %c0_i32_1 = arith.constant 0 : i32
    return %c0_i32, %c0_i32_0 : i32, i32
  }
  func.func @transform_8(%arg0: i32) -> (i32, i32) {
    %c0_i32 = arith.constant 0 : i32
    %c0_i32_0 = arith.constant 0 : i32
    %c0_i32_1 = arith.constant 0 : i32
    return %c0_i32, %c0_i32_0 : i32, i32
  }
  func.func @transform_9(%arg0: i32) -> (i32, i32) {
    %c0_i32 = arith.constant 0 : i32
    %c0_i32_0 = arith.constant 0 : i32
    %c0_i32_1 = arith.constant 0 : i32
    return %c0_i32, %c0_i32_0 : i32, i32
  }
  func.func @transform_10(%arg0: i32) -> (i32, i32) {
    %c0_i32 = arith.constant 0 : i32
    %c0_i32_0 = arith.constant 0 : i32
    %c0_i32_1 = arith.constant 0 : i32
    return %c0_i32, %c0_i32_0 : i32, i32
  }
  func.func @transform_11(%arg0: i32) -> (i32, i32) {
    %c0_i32 = arith.constant 0 : i32
    %c0_i32_0 = arith.constant 0 : i32
    %c0_i32_1 = arith.constant 0 : i32
    return %c0_i32, %c0_i32_0 : i32, i32
  }
  func.func @transform_12(%arg0: i32) -> (i32, i32) {
    %c0_i32 = arith.constant 0 : i32
    %c0_i32_0 = arith.constant 0 : i32
    %c0_i32_1 = arith.constant 0 : i32
    return %c0_i32, %c0_i32_0 : i32, i32
  }
  func.func @transform_13(%arg0: i32) -> (i32, i32) {
    %c0_i32 = arith.constant 0 : i32
    %c0_i32_0 = arith.constant 0 : i32
    return %arg0, %c0_i32 : i32, i32
  }
}

module attributes {stable_mosaic.version = 11 : i64} {
  func.func @autoencoder_kernel(%arg0: i32, %arg1: memref<128x256xbf16, #tpu.memory_space<vmem>>, %arg2: memref<256x64xbf16, #tpu.memory_space<vmem>>, %arg3: memref<1x64xf32, #tpu.memory_space<vmem>>, %arg4: memref<64x32xbf16, #tpu.memory_space<vmem>>, %arg5: memref<1x32xf32, #tpu.memory_space<vmem>>, %arg6: memref<32x32xbf16, #tpu.memory_space<vmem>>, %arg7: memref<1x32xf32, #tpu.memory_space<vmem>>, %arg8: memref<32x32xbf16, #tpu.memory_space<vmem>>, %arg9: memref<1x32xf32, #tpu.memory_space<vmem>>, %arg10: memref<32x64xbf16, #tpu.memory_space<vmem>>, %arg11: memref<1x64xf32, #tpu.memory_space<vmem>>, %arg12: memref<64x256xbf16, #tpu.memory_space<vmem>>, %arg13: memref<1x256xf32, #tpu.memory_space<vmem>>, %arg14: memref<128x256xbf16, #tpu.memory_space<vmem>>) attributes {dimension_semantics = [#tpu.dimension_semantics<parallel>], iteration_bounds = array<i64: 4>, scalar_prefetch = 0 : i64, scratch_operands = 0 : i64, tpu.core_type = #tpu.core_type<tc>, window_params = [{transform_indices = @transform_0, window_bounds = array<i64: 128, 256>}, {pipeline_mode = #tpu.pipeline_mode<synchronous>, transform_indices = @transform_1, window_bounds = array<i64: 256, 64>}, {pipeline_mode = #tpu.pipeline_mode<synchronous>, transform_indices = @transform_2, window_bounds = array<i64: 1, 64>}, {pipeline_mode = #tpu.pipeline_mode<synchronous>, transform_indices = @transform_3, window_bounds = array<i64: 64, 32>}, {pipeline_mode = #tpu.pipeline_mode<synchronous>, transform_indices = @transform_4, window_bounds = array<i64: 1, 32>}, {pipeline_mode = #tpu.pipeline_mode<synchronous>, transform_indices = @transform_5, window_bounds = array<i64: 32, 32>}, {pipeline_mode = #tpu.pipeline_mode<synchronous>, transform_indices = @transform_6, window_bounds = array<i64: 1, 32>}, {pipeline_mode = #tpu.pipeline_mode<synchronous>, transform_indices = @transform_7, window_bounds = array<i64: 32, 32>}, {pipeline_mode = #tpu.pipeline_mode<synchronous>, transform_indices = @transform_8, window_bounds = array<i64: 1, 32>}, {pipeline_mode = #tpu.pipeline_mode<synchronous>, transform_indices = @transform_9, window_bounds = array<i64: 32, 64>}, {pipeline_mode = #tpu.pipeline_mode<synchronous>, transform_indices = @transform_10, window_bounds = array<i64: 1, 64>}, {pipeline_mode = #tpu.pipeline_mode<synchronous>, transform_indices = @transform_11, window_bounds = array<i64: 64, 256>}, {pipeline_mode = #tpu.pipeline_mode<synchronous>, transform_indices = @transform_12, window_bounds = array<i64: 1, 256>}, {transform_indices = @transform_13, window_bounds = array<i64: 128, 256>}]} {
    %c0 = arith.constant 0 : index
    %c0_0 = arith.constant 0 : index
    %0 = vector.load %arg1[%c0, %c0_0] : memref<128x256xbf16, #tpu.memory_space<vmem>>, vector<128x256xbf16>
    %c0_1 = arith.constant 0 : index
    %c0_2 = arith.constant 0 : index
    %1 = vector.load %arg2[%c0_1, %c0_2] : memref<256x64xbf16, #tpu.memory_space<vmem>>, vector<256x64xbf16>
    %cst = arith.constant dense<0.000000e+00> : vector<128x64xf32>
    %2 = tpu.matmul %0, %1, %cst {dimension_numbers = #tpu.dot_dimension_numbers<[1], [0], [0], [1], [0, 0, 1, 1], [], []>} : vector<128x256xbf16>, vector<256x64xbf16>, vector<128x64xf32> -> vector<128x64xf32>
    %c0_3 = arith.constant 0 : index
    %c0_4 = arith.constant 0 : index
    %3 = vector.load %arg3[%c0_3, %c0_4] : memref<1x64xf32, #tpu.memory_space<vmem>>, vector<1x64xf32>
    %4 = vector.broadcast %3 : vector<1x64xf32> to vector<128x64xf32>
    %5 = arith.addf %2, %4 : vector<128x64xf32>
    %cst_5 = arith.constant 0.000000e+00 : f32
    %6 = vector.broadcast %cst_5 : f32 to vector<128x64xf32>
    %7 = arith.maximumf %5, %6 : vector<128x64xf32>
    %8 = arith.truncf %7 : vector<128x64xf32> to vector<128x64xbf16>
    %c0_6 = arith.constant 0 : index
    %c0_7 = arith.constant 0 : index
    %9 = vector.load %arg4[%c0_6, %c0_7] : memref<64x32xbf16, #tpu.memory_space<vmem>>, vector<64x32xbf16>
    %cst_8 = arith.constant dense<0.000000e+00> : vector<128x32xf32>
    %10 = tpu.matmul %8, %9, %cst_8 {dimension_numbers = #tpu.dot_dimension_numbers<[1], [0], [0], [1], [0, 0, 1, 1], [], []>} : vector<128x64xbf16>, vector<64x32xbf16>, vector<128x32xf32> -> vector<128x32xf32>
    %c0_9 = arith.constant 0 : index
    %c0_10 = arith.constant 0 : index
    %11 = vector.load %arg5[%c0_9, %c0_10] : memref<1x32xf32, #tpu.memory_space<vmem>>, vector<1x32xf32>
    %12 = vector.broadcast %11 : vector<1x32xf32> to vector<128x32xf32>
    %13 = arith.addf %10, %12 : vector<128x32xf32>
    %cst_11 = arith.constant 0.000000e+00 : f32
    %14 = vector.broadcast %cst_11 : f32 to vector<128x32xf32>
    %15 = arith.maximumf %13, %14 : vector<128x32xf32>
    %16 = arith.truncf %15 : vector<128x32xf32> to vector<128x32xbf16>
    %c0_12 = arith.constant 0 : index
    %c0_13 = arith.constant 0 : index
    %17 = vector.load %arg6[%c0_12, %c0_13] : memref<32x32xbf16, #tpu.memory_space<vmem>>, vector<32x32xbf16>
    %cst_14 = arith.constant dense<0.000000e+00> : vector<128x32xf32>
    %18 = tpu.matmul %16, %17, %cst_14 {dimension_numbers = #tpu.dot_dimension_numbers<[1], [0], [0], [1], [0, 0, 1, 1], [], []>} : vector<128x32xbf16>, vector<32x32xbf16>, vector<128x32xf32> -> vector<128x32xf32>
    %c0_15 = arith.constant 0 : index
    %c0_16 = arith.constant 0 : index
    %19 = vector.load %arg7[%c0_15, %c0_16] : memref<1x32xf32, #tpu.memory_space<vmem>>, vector<1x32xf32>
    %20 = vector.broadcast %19 : vector<1x32xf32> to vector<128x32xf32>
    %21 = arith.addf %18, %20 : vector<128x32xf32>
    %cst_17 = arith.constant 0.000000e+00 : f32
    %22 = vector.broadcast %cst_17 : f32 to vector<128x32xf32>
    %23 = arith.maximumf %21, %22 : vector<128x32xf32>
    %24 = arith.truncf %23 : vector<128x32xf32> to vector<128x32xbf16>
    %c0_18 = arith.constant 0 : index
    %c0_19 = arith.constant 0 : index
    %25 = vector.load %arg8[%c0_18, %c0_19] : memref<32x32xbf16, #tpu.memory_space<vmem>>, vector<32x32xbf16>
    %cst_20 = arith.constant dense<0.000000e+00> : vector<128x32xf32>
    %26 = tpu.matmul %24, %25, %cst_20 {dimension_numbers = #tpu.dot_dimension_numbers<[1], [0], [0], [1], [0, 0, 1, 1], [], []>} : vector<128x32xbf16>, vector<32x32xbf16>, vector<128x32xf32> -> vector<128x32xf32>
    %c0_21 = arith.constant 0 : index
    %c0_22 = arith.constant 0 : index
    %27 = vector.load %arg9[%c0_21, %c0_22] : memref<1x32xf32, #tpu.memory_space<vmem>>, vector<1x32xf32>
    %28 = vector.broadcast %27 : vector<1x32xf32> to vector<128x32xf32>
    %29 = arith.addf %26, %28 : vector<128x32xf32>
    %cst_23 = arith.constant 0.000000e+00 : f32
    %30 = vector.broadcast %cst_23 : f32 to vector<128x32xf32>
    %31 = arith.maximumf %29, %30 : vector<128x32xf32>
    %32 = arith.truncf %31 : vector<128x32xf32> to vector<128x32xbf16>
    %c0_24 = arith.constant 0 : index
    %c0_25 = arith.constant 0 : index
    %33 = vector.load %arg10[%c0_24, %c0_25] : memref<32x64xbf16, #tpu.memory_space<vmem>>, vector<32x64xbf16>
    %cst_26 = arith.constant dense<0.000000e+00> : vector<128x64xf32>
    %34 = tpu.matmul %32, %33, %cst_26 {dimension_numbers = #tpu.dot_dimension_numbers<[1], [0], [0], [1], [0, 0, 1, 1], [], []>} : vector<128x32xbf16>, vector<32x64xbf16>, vector<128x64xf32> -> vector<128x64xf32>
    %c0_27 = arith.constant 0 : index
    %c0_28 = arith.constant 0 : index
    %35 = vector.load %arg11[%c0_27, %c0_28] : memref<1x64xf32, #tpu.memory_space<vmem>>, vector<1x64xf32>
    %36 = vector.broadcast %35 : vector<1x64xf32> to vector<128x64xf32>
    %37 = arith.addf %34, %36 : vector<128x64xf32>
    %cst_29 = arith.constant 0.000000e+00 : f32
    %38 = vector.broadcast %cst_29 : f32 to vector<128x64xf32>
    %39 = arith.maximumf %37, %38 : vector<128x64xf32>
    %40 = arith.truncf %39 : vector<128x64xf32> to vector<128x64xbf16>
    %c0_30 = arith.constant 0 : index
    %c0_31 = arith.constant 0 : index
    %41 = vector.load %arg12[%c0_30, %c0_31] : memref<64x256xbf16, #tpu.memory_space<vmem>>, vector<64x256xbf16>
    %cst_32 = arith.constant dense<0.000000e+00> : vector<128x256xf32>
    %42 = tpu.matmul %40, %41, %cst_32 {dimension_numbers = #tpu.dot_dimension_numbers<[1], [0], [0], [1], [0, 0, 1, 1], [], []>} : vector<128x64xbf16>, vector<64x256xbf16>, vector<128x256xf32> -> vector<128x256xf32>
    %c0_33 = arith.constant 0 : index
    %c0_34 = arith.constant 0 : index
    %43 = vector.load %arg13[%c0_33, %c0_34] : memref<1x256xf32, #tpu.memory_space<vmem>>, vector<1x256xf32>
    %44 = vector.broadcast %43 : vector<1x256xf32> to vector<128x256xf32>
    %45 = arith.addf %42, %44 : vector<128x256xf32>
    %46 = arith.truncf %45 : vector<128x256xf32> to vector<128x256xbf16>
    %c0_35 = arith.constant 0 : index
    %c0_36 = arith.constant 0 : index
    %47 = vector.load %arg14[%c0_35, %c0_36] : memref<128x256xbf16, #tpu.memory_space<vmem>>, vector<128x256xbf16>
    tpu.vector_store %arg14[%c0_35, %c0_36], %46 {strides = array<i32>} : memref<128x256xbf16, #tpu.memory_space<vmem>>, vector<128x256xbf16>,
    return
  }
  func.func @transform_0(%arg0: i32) -> (i32, i32) {
    %c0_i32 = arith.constant 0 : i32
    %c0_i32_0 = arith.constant 0 : i32
    return %arg0, %c0_i32 : i32, i32
  }
  func.func @transform_1(%arg0: i32) -> (i32, i32) {
    %c0_i32 = arith.constant 0 : i32
    %c0_i32_0 = arith.constant 0 : i32
    %c0_i32_1 = arith.constant 0 : i32
    return %c0_i32, %c0_i32_0 : i32, i32
  }
  func.func @transform_2(%arg0: i32) -> (i32, i32) {
    %c0_i32 = arith.constant 0 : i32
    %c0_i32_0 = arith.constant 0 : i32
    %c0_i32_1 = arith.constant 0 : i32
    return %c0_i32, %c0_i32_0 : i32, i32
  }
  func.func @transform_3(%arg0: i32) -> (i32, i32) {
    %c0_i32 = arith.constant 0 : i32
    %c0_i32_0 = arith.constant 0 : i32
    %c0_i32_1 = arith.constant 0 : i32
    return %c0_i32, %c0_i32_0 : i32, i32
  }
  func.func @transform_4(%arg0: i32) -> (i32, i32) {
    %c0_i32 = arith.constant 0 : i32
    %c0_i32_0 = arith.constant 0 : i32
    %c0_i32_1 = arith.constant 0 : i32
    return %c0_i32, %c0_i32_0 : i32, i32
  }
  func.func @transform_5(%arg0: i32) -> (i32, i32) {
    %c0_i32 = arith.constant 0 : i32
    %c0_i32_0 = arith.constant 0 : i32
    %c0_i32_1 = arith.constant 0 : i32
    return %c0_i32, %c0_i32_0 : i32, i32
  }
  func.func @transform_6(%arg0: i32) -> (i32, i32) {
    %c0_i32 = arith.constant 0 : i32
    %c0_i32_0 = arith.constant 0 : i32
    %c0_i32_1 = arith.constant 0 : i32
    return %c0_i32, %c0_i32_0 : i32, i32
  }
  func.func @transform_7(%arg0: i32) -> (i32, i32) {
    %c0_i32 = arith.constant 0 : i32
    %c0_i32_0 = arith.constant 0 : i32
    %c0_i32_1 = arith.constant 0 : i32
    return %c0_i32, %c0_i32_0 : i32, i32
  }
  func.func @transform_8(%arg0: i32) -> (i32, i32) {
    %c0_i32 = arith.constant 0 : i32
    %c0_i32_0 = arith.constant 0 : i32
    %c0_i32_1 = arith.constant 0 : i32
    return %c0_i32, %c0_i32_0 : i32, i32
  }
  func.func @transform_9(%arg0: i32) -> (i32, i32) {
    %c0_i32 = arith.constant 0 : i32
    %c0_i32_0 = arith.constant 0 : i32
    %c0_i32_1 = arith.constant 0 : i32
    return %c0_i32, %c0_i32_0 : i32, i32
  }
  func.func @transform_10(%arg0: i32) -> (i32, i32) {
    %c0_i32 = arith.constant 0 : i32
    %c0_i32_0 = arith.constant 0 : i32
    %c0_i32_1 = arith.constant 0 : i32
    return %c0_i32, %c0_i32_0 : i32, i32
  }
  func.func @transform_11(%arg0: i32) -> (i32, i32) {
    %c0_i32 = arith.constant 0 : i32
    %c0_i32_0 = arith.constant 0 : i32
    %c0_i32_1 = arith.constant 0 : i32
    return %c0_i32, %c0_i32_0 : i32, i32
  }
  func.func @transform_12(%arg0: i32) -> (i32, i32) {
    %c0_i32 = arith.constant 0 : i32
    %c0_i32_0 = arith.constant 0 : i32
    %c0_i32_1 = arith.constant 0 : i32
    return %c0_i32, %c0_i32_0 : i32, i32
  }
  func.func @transform_13(%arg0: i32) -> (i32, i32) {
    %c0_i32 = arith.constant 0 : i32
    %c0_i32_0 = arith.constant 0 : i32
    return %arg0, %c0_i32 : i32, i32
  }
}

</mosaic_0001>

<bundles_post_ra>
// kernel: tpu_custom_call.1
= control target key start
LH: loop header
LB: loop body
LE: loop exit
PB: predicated region body
PF: predicated region fallthrough
CT: control target
= control target key end

     0   :  { %18 = vsyncpa [#allocation3], 0  ;;  %s2958_s0 = inlined_call_operand.hbm [shape: bf16[512,256], index: 0, kind: input, shape index: {}]   ;;  %s2959_s1 = inlined_call_operand.vmem [shape: bf16[256,64], index: 1, kind: input, shape index: {}]   ;;  %s2960_s2 = inlined_call_operand.vmem [shape: f32[1,64], index: 2, kind: input, shape index: {}]   ;;  %s2961_s3 = inlined_call_operand.vmem [shape: bf16[64,32], index: 3, kind: input, shape index: {}]   ;;  %s2962_s4 = inlined_call_operand.vmem [shape: f32[1,32], index: 4, kind: input, shape index: {}]   ;;  %s2963_s5 = inlined_call_operand.vmem [shape: bf16[32,32], index: 5, kind: input, shape index: {}]   ;;  %s2964_s6 = inlined_call_operand.vmem [shape: f32[1,32], index: 6, kind: input, shape index: {}]   ;;  %s2965_s7 = inlined_call_operand.vmem [shape: bf16[32,32], index: 7, kind: input, shape index: {}]   ;;  %s2966_s8 = inlined_call_operand.vmem [shape: f32[1,32], index: 8, kind: input, shape index: {}]   ;;  %s2967_s9 = inlined_call_operand.vmem [shape: bf16[32,64], index: 9, kind: input, shape index: {}]   ;;  %s2968_s10 = inlined_call_operand.vmem [shape: f32[1,64], index: 10, kind: input, shape index: {}]   ;;  %s2969_s11 = inlined_call_operand.vmem [shape: bf16[64,256], index: 11, kind: input, shape index: {}]   ;;  %s2970_s12 = inlined_call_operand.vmem [shape: f32[1,256], index: 12, kind: input, shape index: {}]   ;;  %s2971_s13 = inlined_call_operand.hbm [shape: bf16[512,256], index: 13, kind: output, shape index: {}]  }
   0x1   :  { %20 = vsyncpa [#allocation3 + $0x1], 0 }
   0x2   :  { %21 = vsyncpa [#allocation4], 0 }
   0x3   :  { %23 = vsyncpa [#allocation4 + $0x1], 0  ;;  %s2535_s25 = smov 0   ;;  %s2537_s26 = smov 0  }
   0x4   :  { %s2539_s27 = smov 0   ;;  %s2541_s28 = smov 0  }
   0x5 LB: > { %2978 = sst [smem:[#allocation8_spill]] %s2444_s25  ;;  %s2556_s29 = sadd.s32 4294967295, %s2456_s28   ;;  %s2456_s28 = sphi %s2541_s28, %s2991_s28   ;;  %s2452_s27 = sphi %s2539_s27, %s2993_s27   ;;  %s2448_s26 = sphi %s2537_s26, %s2995_s26   ;;  %s2444_s25 = sphi %s2535_s25, %s2994_s25  }
   0x6   : > { %2979 = sst [smem:[#allocation9_spill]] %s2452_s27  ;;  %s1902_s30 = sadd.s32 4294967294, %s2456_s28  }
   0x7   : > { %s2560_s14 = sadd.s32 1, %s2456_s28   ;;  %s36_s15 = sadd.s32 1, %s2452_s27 }
   0x8   : > { %2980 = sst [smem:[#allocation10_spill]] %s2560_s14  ;;  %s33_s16 = ssub.s32 %s2456_s28, %s2560_s14 }
   0x9   : > { %p43_p0 = scmp.ne.s32.totalorder %s2452_s27, %s2448_s26  ;;  %p34_p1 = scmp.eq.s32.totalorder %s33_s16, 0 }
   0xa   : > { %p44_p2 = scmp.eq.s32.totalorder %s2456_s28, 0  ;;  %p49_p3 = scmp.ne.s32.totalorder %s2448_s26, %s2444_s25 }
   0xb   : > { %p50_p4 = scmp.eq.s32.totalorder %s2556_s29, 0  ;;  %p325_p7 = scmp.eq.s32.totalorder %s2556_s29, 3 }
   0xc   : > { %s2572_s17 = scalar_select %p34_p1, %s2452_s27, %s36_s15  }
   0xd   : > { %p2574_p5 = por %p44_p2, %p43_p0  ;;  %p2578_p6 = por %p50_p4, %p49_p3 }
   0xe   : > { %2981 = sst [smem:[#allocation11_spill]] %s2572_s17  ;;  %p331_p8 = scmp.eq.s32.totalorder %s1902_s30, 3 }
   0xf   : > { %p2259_p9 = scmp.lt.s32.totalorder %s2456_s28, 4  ;;  %p2584_p10 = por %p325_p7, %p43_p0 }
  0x10   : > { %p2588_p11 = por %p331_p8, %p49_p3  ;;  %s387_s22 = sand.u32 1, %s2452_s27  }
  0x11   : > { %s2984_s20 = scalar_select %p2584_p10, 1, 0 }
  0x12   : > { %s2985_s21 = scalar_select %p2588_p11, 1, 0 }
  0x13   : > { %s2030_s23 = sshll.u32 %s2456_s28, 11  ;;  %s1905_s24 = sshll.u32 %s387_s22, 7 }
  0x14   : > { %s2597_s17 = scalar_lea.hbm %s2958_s0, %s2030_s23  ;;  %s391_s30 = scalar_lea.vmem [#allocation2], %s1905_s24 }
  0x15   : > { %s399_s14 = sshll.u32 %s391_s30, 4  ;;  %p2601_p12 = pnand %p2259_p9, %p2574_p5  ;;  %s2605_s14 = int_to_ptr.vmem [resolvable:$true] %s399_s14 }
  0x16   : > { %s2607_s27 = scalar_lea.sflag [#allocation3], %s387_s22  ;;  %s2360_s15 = scalar_lea.hbm %s2597_s17, 2048 }
  0x17   : > { %p2361_p13 = scmp.ne.s32.totalorder %s2597_s17, %s2360_s15  ;;  %p2362_p0 = pneg %p2601_p12 }
  0x18   : > { %s2365_s24 = scalar_lea.hbm %s2958_s0, 8192  ;;  %p2366_p3 = scmp.lt.u32.totalorder %s2597_s17, %s2958_s0 }
  0x19   : > { %p2363_p1 = pnand %p2362_p0, %p2361_p13  ;;  %p2367_p4 = scmp.lt.u32.totalorder %s2365_s24, %s2360_s15 }
  0x1a   : > { %p2369_p7 = scmp.lt.u32.totalorder %s2360_s15, %s2597_s17 }
  0x1b   : > { %p2364_p2 = pneg %p2363_p1  ;;  %p2368_p5 = por %p2367_p4, %p2366_p3 }
  0x1d   : > { %p2370_p8 = por %p2369_p7, %p2368_p5 }
  0x1f   : > { %p2371_p9 = pnand %p2370_p8, %p2364_p2 }
  0x21   : > { %2374 = shalt.err (!%p2371_p9)
}
  0x22   : > { %s2375_s22 = scalar_lea.vmem %s2605_s14, 2048  ;;  %s2458_s23 = smov [#allocation2]  }
  0x23   : > { %p2376_p13 = scmp.ne.s32.totalorder %s2605_s14, %s2375_s22  ;;  %s2380_s18 = sshll.u32 %s2458_s23, 4  ;;  %s2381_s18 = int_to_ptr.vmem [resolvable:$false] %s2380_s18 }
  0x24   : > { %s2382_s16 = scalar_lea.vmem %s2381_s18, 4096  ;;  %p2383_p10 = scmp.lt.s32.totalorder %s2605_s14, %s2381_s18 }
  0x25   : > { %p2378_p1 = pnand %p2376_p13, %p2362_p0  ;;  %p2384_p3 = scmp.lt.s32.totalorder %s2382_s16, %s2375_s22 }
  0x27   : > { %p2379_p11 = pneg %p2378_p1  ;;  %p2385_p4 = por %p2384_p3, %p2383_p10 }
  0x29   : > { %p2386_p5 = pnand %p2385_p4, %p2379_p11 }
  0x2b   : > { %2389 = shalt.err (!%p2386_p5)
}
  0x2c   : > { %s2459_s15 = smov 128   ;;  %s2460_s24 = smov 8  }
  0x2d   : > { %2254 = dma.hbm_to_vmem [thread:$0]  (!%p2601_p12), %s2597_s17, 2048, %s2605_s14, %s2607_s27, %s2459_s15, %s2459_s15, %s2460_s24  }
  0x2e   : > { %p1909_p0 = scmp.ge.s32.totalorder %s2456_s28, 1  ;;  %p407_p2 = scmp.lt.s32.totalorder %s2456_s28, 5 }
  0x30   : > { %p408_p7 = pnand %p1909_p0, %p407_p2 }
  0x31   : > { %s2638_s30 = sand.u32 (!%p408_p7), 1, %s2448_s26  }
  0x32   : > { %411 = sbr.rel (%p408_p7) target bundleno = 1499 (0x5db), region = 72  ;;  %s2977_s22 = sshll.u32 (!%p408_p7), %s2638_s30, 7 }
  0x33   : > { %s414_s23 = scalar_lea.sflag (!%p408_p7), [#allocation3], %s2638_s30  ;;  %s2644_s18 = scalar_lea.vmem (!%p408_p7), [#allocation2], %s2977_s22 }
  0x39   : > { %2435 = dma.done.wait (%p2578_p6), %s414_s23, 2048  }
  0x3a   : > { %2437 = vsyncadd (%p2578_p6), %s414_s23, 4294965248  ;;  %v2298_v0 = vld [vmem:[%s2959_s1 + $0x40] sm:$0xff]   ;;  %v2300_v2 = vld [vmem:[%s2959_s1 + $0x48] sm:$0xff]   ;;  %vm854_vm0 = vcmask 523264   ;;  %vm1023_vm1 = vcmask 261120   ;;  %s2987_s15 = sshll.u32 %s2638_s30, 7 }
  0x3b   : > { %v2299_v1 = vld [vmem:[%s2959_s1] sm:$0xff]   ;;  %2049 = vmatprep.subr.bf16.mxu0 %v2298_v0  ;;  %v2301_v3 = vld [vmem:[%s2959_s1 + $0x8] sm:$0xff]   ;;  %v2302_v4 = vld [vmem:[%s2959_s1 + $0x50] sm:$0xff]   ;;  %s2862_s24 = scalar_lea.vmem [#allocation5], %s2987_s15  ;;  %s2048_s19 = sshll.u32 %s2556_s29, 11 }
  0x3c   : > { %2050 = vmatpush3.bf16.msra.mxu0 %v2299_v1  ;;  %v2303_v5 = vld [vmem:[%s2959_s1 + $0x10] sm:$0xff]   ;;  %v2304_v6 = vld [vmem:[%s2959_s1 + $0x58] sm:$0xff]   ;;  %v2306_v8 = vld [vmem:[%s2959_s1 + $0x60] sm:$0xff]   ;;  %s1829_s23 = sshll.u32 %s2862_s24, 4  ;;  %s1815_s29 = scalar_lea.sflag [#allocation4], %s2638_s30  ;;  %s2913_s23 = int_to_ptr.vmem [resolvable:$true] %s1829_s23 }
  0x3d   : > { %2051 = vmatprep.subr.bf16.mxu0 %v2300_v2  ;;  %v2305_v7 = vld [vmem:[%s2959_s1 + $0x18] sm:$0xff]   ;;  %v2307_v9 = vld [vmem:[%s2959_s1 + $0x20] sm:$0xff]   ;;  %v2308_v10 = vld [vmem:[%s2959_s1 + $0x68] sm:$0xff]   ;;  %s2390_s14 = scalar_lea.vmem %s2913_s23, 2048  ;;  %p2988_p10 = scmp.ne.s32.totalorder %s2984_s20, 0 }
  0x3e   : > { %v2316_v11 = vld [vmem:[%s2644_s18 + $0x4] ss:$8 sps:$4 sm:$0xff]   ;;  %v2310_v13 = vld [vmem:[%s2959_s1 + $0x70] sm:$0xff]   ;;  %v2312_v15 = vld [vmem:[%s2959_s1 + $0x78] sm:$0xff]   ;;  %p2391_p6 = scmp.ne.s32.totalorder %s2913_s23, %s2390_s14  ;;  %s2462_s17 = smov [#allocation5]  }
  0x3f   : > { %v2309_v12 = vld [vmem:[%s2959_s1 + $0x28] sm:$0xff]   ;;  %726 = vmatprep.mubr.bf16.mxu0 %v2316_v11  ;;  %v2311_v14 = vld [vmem:[%s2959_s1 + $0x30] sm:$0xff]   ;;  %v2313_v16 = vld [vmem:[%s2959_s1 + $0x38] sm:$0xff]   ;;  %s2394_s16 = sshll.u32 %s2462_s17, 4  ;;  %s2395_s16 = int_to_ptr.vmem [resolvable:$false] %s2394_s16 }
  0x40   : > { %2052 = vmatpush3.bf16.msra.mxu0 %v2301_v3  ;;  %v2338_v17 = vld [vmem:[%s2961_s3] sm:$0xff]   ;;  %v2317_v19 = vld [vmem:[%s2644_s18 + $0x14] ss:$8 sps:$4 sm:$0xff]   ;;  %v2339_v20 = vld [vmem:[%s2961_s3 + $0x8] sm:$0xff]   ;;  %p2392_p11 = pnand %p2391_p6, %p2988_p10  ;;  %s2396_s22 = scalar_lea.vmem %s2395_s16, 4096 }
  0x41   : > { %2053 = vmatprep.subr.bf16.mxu0 %v2302_v4  ;;  %v2314_v18 = vld [vmem:[%s2644_s18] ss:$8 sps:$4 sm:$0xff]   ;;  %2239 = vmatprep.subr.bf16.mxu1 %v2338_v17  ;;  %v2340_v21 = vld [vmem:[%s2961_s3 + $0x10] sm:$0xff]   ;;  %v2320_v23 = vld [vmem:[%s2644_s18 + $0x24] ss:$8 sps:$4 sm:$0xff]   ;;  %p2397_p8 = scmp.lt.s32.totalorder %s2913_s23, %s2395_s16  ;;  %p2398_p9 = scmp.lt.s32.totalorder %s2396_s22, %s2390_s14 }
  0x42   : > { %2243 = vmatpush3.bf16.msra.mxu1 %v2338_v17  ;;  %v2319_v22 = vld [vmem:[%s2644_s18 + $0x10] ss:$8 sps:$4 sm:$0xff]   ;;  %v2322_v24 = vld [vmem:[%s2644_s18 + $0x20] ss:$8 sps:$4 sm:$0xff]   ;;  %v2323_v25 = vld [vmem:[%s2644_s18 + $0x34] ss:$8 sps:$4 sm:$0xff]   ;;  %p2393_p12 = pneg %p2392_p11 }
  0x43   : > { %2240 = vmatprep.subr.bf16.mxu1 %v2339_v20  ;;  %v2325_v26 = vld [vmem:[%s2644_s18 + $0x30] ss:$8 sps:$4 sm:$0xff]   ;;  %v2326_v27 = vld [vmem:[%s2644_s18 + $0x44] ss:$8 sps:$4 sm:$0xff]   ;;  %v2328_v28 = vld [vmem:[%s2644_s18 + $0x40] ss:$8 sps:$4 sm:$0xff]   ;;  %p2399_p13 = por %p2398_p9, %p2397_p8 }
  0x44   : > { %2054 = vmatpush3.bf16.msra.mxu0 %v2303_v5  ;;  %v2329_v29 = vld [vmem:[%s2644_s18 + $0x54] ss:$8 sps:$4 sm:$0xff]   ;;  %v2331_v30 = vld [vmem:[%s2644_s18 + $0x50] ss:$8 sps:$4 sm:$0xff]   ;;  %v2332_v31 = vld [vmem:[%s2644_s18 + $0x64] ss:$8 sps:$4 sm:$0xff]  }
  0x45   : > { %2055 = vmatprep.subr.bf16.mxu0 %v2304_v6  ;;  %v2334_v32 = vld [vmem:[%s2644_s18 + $0x60] ss:$8 sps:$4 sm:$0xff]   ;;  %v2335_v33 = vld [vmem:[%s2644_s18 + $0x74] ss:$8 sps:$4 sm:$0xff]   ;;  %v2337_v34 = vld [vmem:[%s2644_s18 + $0x70] ss:$8 sps:$4 sm:$0xff]   ;;  %s2911_s18 = scalar_lea.hbm %s2971_s13, %s2048_s19  ;;  %p2400_p1 = pnand %p2399_p13, %p2393_p12 }
  0x46   : > { %2244 = vmatpush3.bf16.msra.mxu1 %v2339_v20  ;;  %v2341_v35 = vld [vmem:[%s2961_s3 + $0x18] sm:$0xff]   ;;  %v2729_v37 = vld [vmem:[%s2960_s2] ss:$0 sm:$0xff] }
  0x47   : > { %2241 = vmatprep.subr.bf16.mxu1 %v2340_v21 }
  0x48   : > { %2056 = vmatpush3.bf16.msra.mxu0 %v2305_v7 }
  0x49   : > { %2057 = vmatprep.subr.bf16.mxu0 %v2306_v8 }
  0x4a   : > { %2245 = vmatpush3.bf16.msra.mxu1 %v2340_v21 }
  0x4b   : > { %2242 = vmatprep.subr.bf16.mxu1 %v2341_v35 }
  0x4c   : > { %2058 = vmatpush3.bf16.msra.mxu0 %v2307_v9 }
  0x4d   : > { %2059 = vmatprep.subr.bf16.mxu0 %v2308_v10 }
  0x4e   : > { %2246 = vmatpush3.bf16.msra.mxu1 %v2341_v35 }
  0x50   : > { %2060 = vmatpush3.bf16.msra.mxu0 %v2309_v12 }
  0x51   : > { %2061 = vmatprep.subr.bf16.mxu0 %v2310_v13 }
  0x54   : > { %2062 = vmatpush3.bf16.msra.mxu0 %v2311_v14 }
  0x55   : > { %2063 = vmatprep.subr.bf16.mxu0 %v2312_v15 }
  0x58   : > { %2064 = vmatpush3.bf16.msra.mxu0 %v2313_v16 }
  0x59   : > { %2155 = vmatprep.subr.bf16.mxu0 %v2338_v17 }
  0x5b   : > { %727 = vmatmul.mubr.bf16.vlgmr.msra.gmra.mrb[0].mxu0 %v2314_v18 }
  0x5c   : > { %734 = vmatprep.mubr.bf16.mxu0 %v2317_v19  ;;  %2156 = vmatpush3.bf16.msra.mxu0 %v2338_v17 }
  0x5d   : > { %2157 = vmatprep.subr.bf16.mxu0 %v2339_v20 }
  0x60   : > { %2158 = vmatpush3.bf16.msra.mxu0 %v2339_v20 }
  0x61   : > { %2159 = vmatprep.subr.bf16.mxu0 %v2340_v21 }
  0x63   : > { %735 = vmatmul.mubr.bf16.gmra.mrb[4].mxu0 %v2319_v22 }
  0x64   : > { %742 = vmatprep.mubr.bf16.mxu0 %v2320_v23  ;;  %2160 = vmatpush3.bf16.msra.mxu0 %v2340_v21 }
  0x65   : > { %2161 = vmatprep.subr.bf16.mxu0 %v2341_v35 }
  0x68   : > { %2162 = vmatpush3.bf16.msra.mxu0 %v2341_v35 }
  0x6b   : > { %743 = vmatmul.mubr.bf16.gmra.mrb[8].mxu0 %v2322_v24 }
  0x6c   : > { %750 = vmatprep.mubr.bf16.mxu0 %v2323_v25 }
  0x73   : > { %751 = vmatmul.mubr.bf16.gmra.mrb[12].mxu0 %v2325_v26 }
  0x74   : > { %758 = vmatprep.mubr.bf16.mxu0 %v2326_v27 }
  0x7b   : > { %759 = vmatmul.mubr.bf16.gmra.mrb[16].mxu0 %v2328_v28 }
  0x7c   : > { %766 = vmatprep.mubr.bf16.mxu0 %v2329_v29 }
  0x83   : > { %767 = vmatmul.mubr.bf16.gmra.mrb[20].mxu0 %v2331_v30 }
  0x84   : > { %774 = vmatprep.mubr.bf16.mxu0 %v2332_v31 }
  0x8b   : > { %775 = vmatmul.mubr.bf16.gmra.mrb[24].mxu0 %v2334_v32 }
  0x8c   : > { %782 = vmatprep.mubr.bf16.mxu0 %v2335_v33 }
  0x93   : > { %783 = vmatmul.mubr.bf16.gmra.mrb[28].mxu0 %v2337_v34 }
 0x12e   : > { %v2065_v36 = vpop.f32.mrb[0].mxu0 }
 0x12f   : > { %v2066_v38 = vpop.f32.mrb[1].mxu0 }
 0x130   : > { %v2067_v39 = vadd.f32 %v2066_v38, %v2065_v36  ;;  %v2068_v40 = vpop.f32.mrb[2].mxu0 }
 0x131   : > { %v2069_v41 = vpop.f32.mrb[3].mxu0 }
 0x132   : > { %v729_v42 = vadd.f32 %v2067_v39, %v2729_v37  ;;  %v2070_v43 = vadd.f32 %v2069_v41, %v2068_v40 }
 0x134   : > { %v732_v44 = vadd.f32 %v2070_v43, %v2729_v37  ;;  %v791_v45 = vmax.f32 %v729_v42, 0.0 }
 0x136   : > { %v792_v46 = vmax.f32 %v732_v44, 0.0  ;;  %v2071_v47 = vpop.f32.mrb[4].mxu0 }
 0x137   : > { %v2072_v48 = vpop.f32.mrb[5].mxu0 }
 0x138   : > { %v807_v49 = vpack.c.bf16 %v792_v46, %v791_v45  ;;  %v2073_v50 = vadd.f32 %v2072_v48, %v2071_v47  ;;  %v2074_v51 = vpop.f32.mrb[6].mxu0 }
 0x139   : > { %v2075_v52 = vpop.f32.mrb[7].mxu0 }
 0x13a   : > { %v737_v53 = vadd.f32 %v2073_v50, %v2729_v37  ;;  %v2076_v54 = vadd.f32 %v2075_v52, %v2074_v51  ;;  %2163 = vmatprep.mubr.msk.bf16.mxu0 %vm854_vm0, %v807_v49 }
 0x13c   : > { %v740_v55 = vadd.f32 %v2076_v54, %v2729_v37  ;;  %v793_v56 = vmax.f32 %v737_v53, 0.0 }
 0x13e   : > { %v794_v57 = vmax.f32 %v740_v55, 0.0  ;;  %v2077_v58 = vpop.f32.mrb[8].mxu0 }
 0x13f   : > { %v2078_v59 = vpop.f32.mrb[9].mxu0 }
 0x140   : > { %v808_v60 = vpack.c.bf16 %v794_v57, %v793_v56  ;;  %v2079_v61 = vadd.f32 %v2078_v59, %v2077_v58  ;;  %v2080_v62 = vpop.f32.mrb[10].mxu0 }
 0x141   : > { %v2081_v63 = vpop.f32.mrb[11].mxu0 }
 0x142   : > { %v745_v0 = vadd.f32 %v2079_v61, %v2729_v37  ;;  %v2082_v1 = vadd.f32 %v2081_v63, %v2080_v62  ;;  %2164 = vmatmul.mubr.msk.bf16.vlgmr.msra.gmra.mrb[32].mxu0 %vm854_vm0, %v808_v60  ;;  %v2342_v62 = vld [vmem:[%s2963_s5] sm:$0xff]   ;;  %v2343_v63 = vld [vmem:[%s2963_s5 + $0x8] sm:$0xff]  }
 0x143   : > { %2179 = vmatprep.subr.bf16.mxu1 %v2342_v62 }
 0x144   : > { %v748_v2 = vadd.f32 %v2082_v1, %v2729_v37  ;;  %v795_v3 = vmax.f32 %v745_v0, 0.0  ;;  %v1945_v0 = vld [vmem:[%s2962_s4] ss:$0 sm:$0xff] }
 0x146   : > { %v796_v4 = vmax.f32 %v748_v2, 0.0  ;;  %v2083_v5 = vpop.f32.mrb[12].mxu0 }
 0x147   : > { %v2084_v6 = vpop.f32.mrb[13].mxu0 }
 0x148   : > { %v809_v7 = vpack.c.bf16 %v796_v4, %v795_v3  ;;  %v2085_v8 = vadd.f32 %v2084_v6, %v2083_v5  ;;  %v2086_v9 = vpop.f32.mrb[14].mxu0 }
 0x149   : > { %v2087_v10 = vpop.f32.mrb[15].mxu0 }
 0x14a   : > { %v753_v11 = vadd.f32 %v2085_v8, %v2729_v37  ;;  %v2088_v12 = vadd.f32 %v2087_v10, %v2086_v9  ;;  %2167 = vmatprep.mubr.msk.bf16.mxu0 %vm854_vm0, %v809_v7 }
 0x14c   : > { %v756_v13 = vadd.f32 %v2088_v12, %v2729_v37  ;;  %v797_v14 = vmax.f32 %v753_v11, 0.0 }
 0x14e   : > { %v798_v15 = vmax.f32 %v756_v13, 0.0  ;;  %v2089_v16 = vpop.f32.mrb[16].mxu0 }
 0x14f   : > { %v2090_v17 = vpop.f32.mrb[17].mxu0 }
 0x150   : > { %v810_v18 = vpack.c.bf16 %v798_v15, %v797_v14  ;;  %v2091_v19 = vadd.f32 %v2090_v17, %v2089_v16  ;;  %v2092_v20 = vpop.f32.mrb[18].mxu0  ;;  %v2345_v15 = vld [vmem:[%s2965_s7 + $0x8] sm:$0xff]  }
 0x151   : > { %v2093_v21 = vpop.f32.mrb[19].mxu0 }
 0x152   : > { %v761_v22 = vadd.f32 %v2091_v19, %v2729_v37  ;;  %v2094_v23 = vadd.f32 %v2093_v21, %v2092_v20  ;;  %2168 = vmatmul.mubr.msk.bf16.gmra.mrb[36].mxu0 %vm854_vm0, %v810_v18 }
 0x154   : > { %v764_v24 = vadd.f32 %v2094_v23, %v2729_v37  ;;  %v799_v25 = vmax.f32 %v761_v22, 0.0 }
 0x156   : > { %v800_v26 = vmax.f32 %v764_v24, 0.0  ;;  %v2095_v27 = vpop.f32.mrb[20].mxu0 }
 0x157   : > { %v2096_v28 = vpop.f32.mrb[21].mxu0 }
 0x158   : > { %v811_v29 = vpack.c.bf16 %v800_v26, %v799_v25  ;;  %v2097_v30 = vadd.f32 %v2096_v28, %v2095_v27  ;;  %v2098_v31 = vpop.f32.mrb[22].mxu0 }
 0x159   : > { %v2099_v32 = vpop.f32.mrb[23].mxu0 }
 0x15a   : > { %v769_v33 = vadd.f32 %v2097_v30, %v2729_v37  ;;  %v2100_v34 = vadd.f32 %v2099_v32, %v2098_v31  ;;  %2171 = vmatprep.mubr.msk.bf16.mxu0 %vm854_vm0, %v811_v29 }
 0x15c   : > { %v772_v35 = vadd.f32 %v2100_v34, %v2729_v37  ;;  %v801_v36 = vmax.f32 %v769_v33, 0.0 }
 0x15e   : > { %v802_v38 = vmax.f32 %v772_v35, 0.0  ;;  %v2101_v39 = vpop.f32.mrb[24].mxu0 }
 0x15f   : > { %v2102_v40 = vpop.f32.mrb[25].mxu0 }
 0x160   : > { %v812_v41 = vpack.c.bf16 %v802_v38, %v801_v36  ;;  %v2103_v42 = vadd.f32 %v2102_v40, %v2101_v39  ;;  %v2104_v43 = vpop.f32.mrb[26].mxu0 }
 0x161   : > { %v2105_v44 = vpop.f32.mrb[27].mxu0 }
 0x162   : > { %v777_v45 = vadd.f32 %v2103_v42, %v2729_v37  ;;  %v2106_v46 = vadd.f32 %v2105_v44, %v2104_v43  ;;  %2172 = vmatmul.mubr.msk.bf16.gmra.mrb[40].mxu0 %vm854_vm0, %v812_v41 }
 0x164   : > { %v780_v47 = vadd.f32 %v2106_v46, %v2729_v37  ;;  %v803_v48 = vmax.f32 %v777_v45, 0.0 }
 0x166   : > { %v804_v49 = vmax.f32 %v780_v47, 0.0  ;;  %v2107_v50 = vpop.f32.mrb[28].mxu0 }
 0x167   : > { %v2108_v51 = vpop.f32.mrb[29].mxu0 }
 0x168   : > { %v2109_v52 = vadd.f32 %v2108_v51, %v2107_v50  ;;  %v2110_v53 = vpop.f32.mrb[30].mxu0  ;;  %v813_v54 = vpack.c.bf16 %v804_v49, %v803_v48 }
 0x169   : > { %v2111_v55 = vpop.f32.mrb[31].mxu0 }
 0x16a   : > { %v785_v56 = vadd.f32 %v2109_v52, %v2729_v37  ;;  %v2112_v57 = vadd.f32 %v2111_v55, %v2110_v53  ;;  %2175 = vmatprep.mubr.msk.bf16.mxu1 %vm854_vm0, %v813_v54 }
 0x16c   : > { %v788_v58 = vadd.f32 %v2112_v57, %v2729_v37  ;;  %v805_v59 = vmax.f32 %v785_v56, 0.0  ;;  %v2344_v37 = vld [vmem:[%s2965_s7] sm:$0xff]  }
 0x16e   : > { %v806_v60 = vmax.f32 %v788_v58, 0.0 }
 0x170   : > { %v814_v61 = vpack.c.bf16 %v806_v60, %v805_v59  ;;  %v2346_v59 = vld [vmem:[%s2967_s9] sm:$0xff]   ;;  %v2347_v60 = vld [vmem:[%s2967_s9 + $0x8] sm:$0xff]  }
 0x171   : > { %2219 = vmatprep.subr.bf16.mxu0 %v2346_v59 }
 0x172   : > { %2176 = vmatmul.mubr.msk.bf16.vlgmr.msra.gmra.mrb[0].mxu1 %vm854_vm0, %v814_v61  ;;  %2220 = vmatpush3.bf16.msra.mxu0 %v2346_v59  ;;  %v1958_v61 = vld [vmem:[%s2964_s6] ss:$0 sm:$0xff] }
 0x173   : > { %2180 = vmatpush3.bf16.msra.mxu1 %v2342_v62  ;;  %2221 = vmatprep.subr.bf16.mxu0 %v2347_v60  ;;  %v2354_v59 = vld [vmem:[%s2969_s11 + $0x20] ss:$8 sps:$4 sm:$0xff]  }
 0x174   : > { %2181 = vmatprep.subr.bf16.mxu1 %v2343_v63 }
 0x176   : > { %2222 = vmatpush3.bf16.msra.mxu0 %v2347_v60  ;;  %v1969_v60 = vld [vmem:[%s2966_s8] ss:$0 sm:$0xff] }
 0x177   : > { %2182 = vmatpush3.bf16.msra.mxu1 %v2343_v63 }
 0x178   : > { %2199 = vmatprep.subr.bf16.mxu1 %v2344_v37 }
 0x215   : > { %v2165_v1 = vpop.f32.mrb[32].mxu0 }
 0x216   : > { %v922_v2 = vadd.f32 %v2165_v1, %v1945_v0  ;;  %v913_v3 = vpop.f32.mrb[33].mxu0 }
 0x217   : > { %v914_v4 = vadd.f32 %v1945_v0, %v913_v3  ;;  %v2166_v5 = vpop.f32.mrb[34].mxu0 }
 0x218   : > { %v925_v6 = vadd.f32 %v2166_v5, %v1945_v0  ;;  %v916_v7 = vpop.f32.mrb[35].mxu0  ;;  %v978_v9 = vmax.f32 %v922_v2, 0.0 }
 0x219   : > { %v917_v8 = vadd.f32 %v1945_v0, %v916_v7  ;;  %v976_v11 = vmax.f32 %v914_v4, 0.0 }
 0x21a   : > { %v979_v10 = vmax.f32 %v925_v6, 0.0 }
 0x21b   : > { %v977_v12 = vmax.f32 %v917_v8, 0.0 }
 0x21c   : > { %v993_v13 = vpack.c.bf16 %v979_v10, %v978_v9 }
 0x21d   : > { %v992_v14 = vpack.c.bf16 %v977_v12, %v976_v11 }
 0x21f   : > { %2183 = vmatprep.mubr.msk.bf16.mxu1 %vm1023_vm1, %v992_v14 }
 0x220   : > { %2184 = vmatmul.mubr.msk.bf16.vlgmr.msra.gmra.mrb[4].mxu1 %vm1023_vm1, %v993_v13 }
 0x221   : > { %2200 = vmatpush3.bf16.msra.mxu1 %v2344_v37 }
 0x222   : > { %2201 = vmatprep.subr.bf16.mxu1 %v2345_v15 }
 0x225   : > { %v2169_v16 = vpop.f32.mrb[36].mxu0  ;;  %2202 = vmatpush3.bf16.msra.mxu1 %v2345_v15 }
 0x226   : > { %v938_v17 = vadd.f32 %v2169_v16, %v1945_v0  ;;  %v929_v18 = vpop.f32.mrb[37].mxu0 }
 0x227   : > { %v930_v19 = vadd.f32 %v1945_v0, %v929_v18  ;;  %v2170_v20 = vpop.f32.mrb[38].mxu0 }
 0x228   : > { %v941_v21 = vadd.f32 %v2170_v20, %v1945_v0  ;;  %v932_v22 = vpop.f32.mrb[39].mxu0  ;;  %v982_v24 = vmax.f32 %v938_v17, 0.0 }
 0x229   : > { %v933_v23 = vadd.f32 %v1945_v0, %v932_v22  ;;  %v980_v26 = vmax.f32 %v930_v19, 0.0 }
 0x22a   : > { %v983_v25 = vmax.f32 %v941_v21, 0.0 }
 0x22b   : > { %v981_v27 = vmax.f32 %v933_v23, 0.0 }
 0x22c   : > { %v995_v28 = vpack.c.bf16 %v983_v25, %v982_v24 }
 0x22d   : > { %v994_v29 = vpack.c.bf16 %v981_v27, %v980_v26 }
 0x22f   : > { %2187 = vmatprep.mubr.msk.bf16.mxu1 %vm1023_vm1, %v994_v29 }
 0x230   : > { %2188 = vmatmul.mubr.msk.bf16.gmra.mrb[8].mxu1 %vm1023_vm1, %v995_v28 }
 0x235   : > { %v2173_v30 = vpop.f32.mrb[40].mxu0 }
 0x236   : > { %v954_v31 = vadd.f32 %v2173_v30, %v1945_v0  ;;  %v945_v32 = vpop.f32.mrb[41].mxu0 }
 0x237   : > { %v946_v33 = vadd.f32 %v1945_v0, %v945_v32  ;;  %v2174_v34 = vpop.f32.mrb[42].mxu0 }
 0x238   : > { %v957_v35 = vadd.f32 %v2174_v34, %v1945_v0  ;;  %v948_v36 = vpop.f32.mrb[43].mxu0  ;;  %v986_v39 = vmax.f32 %v954_v31, 0.0 }
 0x239   : > { %v949_v38 = vadd.f32 %v1945_v0, %v948_v36  ;;  %v984_v41 = vmax.f32 %v946_v33, 0.0 }
 0x23a   : > { %v987_v40 = vmax.f32 %v957_v35, 0.0 }
 0x23b   : > { %v985_v42 = vmax.f32 %v949_v38, 0.0 }
 0x23c   : > { %v997_v43 = vpack.c.bf16 %v987_v40, %v986_v39 }
 0x23d   : > { %v996_v44 = vpack.c.bf16 %v985_v42, %v984_v41 }
 0x23f   : > { %2191 = vmatprep.mubr.msk.bf16.mxu1 %vm1023_vm1, %v996_v44 }
 0x240   : > { %2192 = vmatmul.mubr.msk.bf16.gmra.mrb[12].mxu1 %vm1023_vm1, %v997_v43 }
 0x245   : > { %v2177_v45 = vpop.f32.mrb[0].mxu1 }
 0x246   : > { %v970_v46 = vadd.f32 %v2177_v45, %v1945_v0  ;;  %v961_v47 = vpop.f32.mrb[1].mxu1 }
 0x247   : > { %v962_v48 = vadd.f32 %v1945_v0, %v961_v47  ;;  %v2178_v49 = vpop.f32.mrb[2].mxu1 }
 0x248   : > { %v973_v50 = vadd.f32 %v2178_v49, %v1945_v0  ;;  %v964_v51 = vpop.f32.mrb[3].mxu1  ;;  %v990_v53 = vmax.f32 %v970_v46, 0.0 }
 0x249   : > { %v965_v52 = vadd.f32 %v1945_v0, %v964_v51  ;;  %v988_v55 = vmax.f32 %v962_v48, 0.0 }
 0x24a   : > { %v991_v54 = vmax.f32 %v973_v50, 0.0 }
 0x24b   : > { %v989_v56 = vmax.f32 %v965_v52, 0.0 }
 0x24c   : > { %v999_v57 = vpack.c.bf16 %v991_v54, %v990_v53  ;;  %v2348_v54 = vld [vmem:[%s2969_s11] ss:$8 sps:$4 sm:$0xff]  }
 0x24d   : > { %v998_v58 = vpack.c.bf16 %v989_v56, %v988_v55  ;;  %v2350_v55 = vld [vmem:[%s2969_s11 + $0x4] ss:$8 sps:$4 sm:$0xff]   ;;  %v2353_v56 = vld [vmem:[%s2969_s11 + $0x14] ss:$8 sps:$4 sm:$0xff]  }
 0x24e   : > { %1589 = vmatprep.subr.bf16.mxu1 %v2350_v55  ;;  %v2461_v55 = vmov 0  }
 0x24f   : > { %2195 = vmatprep.mubr.msk.bf16.mxu1 %vm1023_vm1, %v998_v58  ;;  %v2356_v58 = vld [vmem:[%s2969_s11 + $0x24] ss:$8 sps:$4 sm:$0xff]  }
 0x250   : > { %2196 = vmatmul.mubr.msk.bf16.gmra.mrb[16].mxu1 %vm1023_vm1, %v999_v57  ;;  %v2351_v57 = vld [vmem:[%s2969_s11 + $0x10] ss:$8 sps:$4 sm:$0xff]  }
 0x2f3   : > { %v2185_v62 = vpop.f32.mrb[4].mxu1 }
 0x2f4   : > { %v1091_v63 = vadd.f32 %v2185_v62, %v1958_v61  ;;  %v1082_v37 = vpop.f32.mrb[5].mxu1 }
 0x2f5   : > { %v1083_v0 = vadd.f32 %v1958_v61, %v1082_v37  ;;  %v2186_v1 = vpop.f32.mrb[6].mxu1 }
 0x2f6   : > { %v1094_v2 = vadd.f32 %v2186_v1, %v1958_v61  ;;  %v1085_v3 = vpop.f32.mrb[7].mxu1  ;;  %v1147_v5 = vmax.f32 %v1091_v63, 0.0 }
 0x2f7   : > { %v1086_v4 = vadd.f32 %v1958_v61, %v1085_v3  ;;  %v1145_v7 = vmax.f32 %v1083_v0, 0.0 }
 0x2f8   : > { %v1148_v6 = vmax.f32 %v1094_v2, 0.0 }
 0x2f9   : > { %v1146_v8 = vmax.f32 %v1086_v4, 0.0 }
 0x2fa   : > { %v1162_v9 = vpack.c.bf16 %v1148_v6, %v1147_v5 }
 0x2fb   : > { %v1161_v10 = vpack.c.bf16 %v1146_v8, %v1145_v7 }
 0x2fd   : > { %2203 = vmatprep.mubr.msk.bf16.mxu1 %vm1023_vm1, %v1161_v10 }
 0x2fe   : > { %2204 = vmatmul.mubr.msk.bf16.vlgmr.msra.gmra.mrb[20].mxu1 %vm1023_vm1, %v1162_v9 }
 0x2ff   : > { %1590 = vmatpush1.bf16.msra.mxu1 %v2348_v54  ;;  %v2359_v54 = vld [vmem:[%s2969_s11 + $0x34] ss:$8 sps:$4 sm:$0xff]  }
 0x300   : > { %1591 = vmatprep.subr.bf16.mxu1 %v2353_v56  ;;  %v1980_v56 = vld [vmem:[%s2968_s10] ss:$0 sm:$0xff] }
 0x303   : > { %v2189_v11 = vpop.f32.mrb[8].mxu1  ;;  %1592 = vmatpush1.bf16.msra.mxu1 %v2351_v57 }
 0x304   : > { %v1107_v12 = vadd.f32 %v2189_v11, %v1958_v61  ;;  %v1098_v13 = vpop.f32.mrb[9].mxu1  ;;  %1593 = vmatprep.subr.bf16.mxu1 %v2356_v58 }
 0x305   : > { %v1099_v14 = vadd.f32 %v1958_v61, %v1098_v13  ;;  %v2190_v15 = vpop.f32.mrb[10].mxu1 }
 0x306   : > { %v1110_v16 = vadd.f32 %v2190_v15, %v1958_v61  ;;  %v1101_v17 = vpop.f32.mrb[11].mxu1  ;;  %v1151_v19 = vmax.f32 %v1107_v12, 0.0 }
 0x307   : > { %v1102_v18 = vadd.f32 %v1958_v61, %v1101_v17  ;;  %v1149_v21 = vmax.f32 %v1099_v14, 0.0  ;;  %1594 = vmatpush1.bf16.msra.mxu1 %v2354_v59 }
 0x308   : > { %v1152_v20 = vmax.f32 %v1110_v16, 0.0  ;;  %1595 = vmatprep.subr.bf16.mxu1 %v2359_v54 }
 0x309   : > { %v1150_v22 = vmax.f32 %v1102_v18, 0.0 }
 0x30a   : > { %v1164_v23 = vpack.c.bf16 %v1152_v20, %v1151_v19 }
 0x30b   : > { %v1163_v24 = vpack.c.bf16 %v1150_v22, %v1149_v21 }
 0x30d   : > { %2207 = vmatprep.mubr.msk.bf16.mxu1 %vm1023_vm1, %v1163_v24 }
 0x30e   : > { %2208 = vmatmul.mubr.msk.bf16.gmra.mrb[24].mxu1 %vm1023_vm1, %v1164_v23 }
 0x313   : > { %v2193_v25 = vpop.f32.mrb[12].mxu1 }
 0x314   : > { %v1123_v26 = vadd.f32 %v2193_v25, %v1958_v61  ;;  %v1114_v27 = vpop.f32.mrb[13].mxu1 }
 0x315   : > { %v1115_v28 = vadd.f32 %v1958_v61, %v1114_v27  ;;  %v2194_v29 = vpop.f32.mrb[14].mxu1 }
 0x316   : > { %v1126_v30 = vadd.f32 %v2194_v29, %v1958_v61  ;;  %v1117_v31 = vpop.f32.mrb[15].mxu1  ;;  %v1155_v33 = vmax.f32 %v1123_v26, 0.0 }
 0x317   : > { %v1118_v32 = vadd.f32 %v1958_v61, %v1117_v31  ;;  %v1153_v35 = vmax.f32 %v1115_v28, 0.0 }
 0x318   : > { %v1156_v34 = vmax.f32 %v1126_v30, 0.0 }
 0x319   : > { %v1154_v36 = vmax.f32 %v1118_v32, 0.0 }
 0x31a   : > { %v1166_v38 = vpack.c.bf16 %v1156_v34, %v1155_v33 }
 0x31b   : > { %v1165_v39 = vpack.c.bf16 %v1154_v36, %v1153_v35 }
 0x31d   : > { %2211 = vmatprep.mubr.msk.bf16.mxu1 %vm1023_vm1, %v1165_v39 }
 0x31e   : > { %2212 = vmatmul.mubr.msk.bf16.gmra.mrb[28].mxu1 %vm1023_vm1, %v1166_v38 }
 0x323   : > { %v2197_v40 = vpop.f32.mrb[16].mxu1 }
 0x324   : > { %v1139_v41 = vadd.f32 %v2197_v40, %v1958_v61  ;;  %v1130_v42 = vpop.f32.mrb[17].mxu1 }
 0x325   : > { %v1131_v43 = vadd.f32 %v1958_v61, %v1130_v42  ;;  %v2198_v44 = vpop.f32.mrb[18].mxu1 }
 0x326   : > { %v1142_v45 = vadd.f32 %v2198_v44, %v1958_v61  ;;  %v1133_v46 = vpop.f32.mrb[19].mxu1  ;;  %v1159_v48 = vmax.f32 %v1139_v41, 0.0 }
 0x327   : > { %v1134_v47 = vadd.f32 %v1958_v61, %v1133_v46  ;;  %v1157_v50 = vmax.f32 %v1131_v43, 0.0 }
 0x328   : > { %v1160_v49 = vmax.f32 %v1142_v45, 0.0 }
 0x329   : > { %v1158_v51 = vmax.f32 %v1134_v47, 0.0 }
 0x32a   : > { %v1168_v52 = vpack.c.bf16 %v1160_v49, %v1159_v48 }
 0x32b   : > { %v1167_v53 = vpack.c.bf16 %v1158_v51, %v1157_v50 }
 0x32d   : > { %2215 = vmatprep.mubr.msk.bf16.mxu1 %vm1023_vm1, %v1167_v53  ;;  %v2357_v53 = vld [vmem:[%s2969_s11 + $0x30] ss:$8 sps:$4 sm:$0xff]  }
 0x32e   : > { %2216 = vmatmul.mubr.msk.bf16.gmra.mrb[32].mxu1 %vm1023_vm1, %v1168_v52 }
 0x32f   : > { %1596 = vmatpush1.bf16.msra.mxu1 %v2357_v53  ;;  %1621 = vmatprep.mubr.bf16.mxu1 %v2461_v55 }
 0x3d1   : > { %v2205_v61 = vpop.f32.mrb[20].mxu1 }
 0x3d2   : > { %v1259_v62 = vadd.f32 %v2205_v61, %v1969_v60  ;;  %v1250_v63 = vpop.f32.mrb[21].mxu1 }
 0x3d3   : > { %v1251_v37 = vadd.f32 %v1969_v60, %v1250_v63  ;;  %v2206_v0 = vpop.f32.mrb[22].mxu1 }
 0x3d4   : > { %v1262_v1 = vadd.f32 %v2206_v0, %v1969_v60  ;;  %v1253_v2 = vpop.f32.mrb[23].mxu1  ;;  %v1315_v4 = vmax.f32 %v1259_v62, 0.0 }
 0x3d5   : > { %v1254_v3 = vadd.f32 %v1969_v60, %v1253_v2  ;;  %v1313_v6 = vmax.f32 %v1251_v37, 0.0 }
 0x3d6   : > { %v1316_v5 = vmax.f32 %v1262_v1, 0.0 }
 0x3d7   : > { %v1314_v7 = vmax.f32 %v1254_v3, 0.0 }
 0x3d8   : > { %v1330_v8 = vpack.c.bf16 %v1316_v5, %v1315_v4 }
 0x3d9   : > { %v1329_v9 = vpack.c.bf16 %v1314_v7, %v1313_v6 }
 0x3db   : > { %2223 = vmatprep.mubr.msk.bf16.mxu0 %vm1023_vm1, %v1329_v9 }
 0x3dc   : > { %2224 = vmatmul.mubr.msk.bf16.vlgmr.msra.gmra.mrb[44].mxu0 %vm1023_vm1, %v1330_v8 }
 0x3e1   : > { %v2209_v10 = vpop.f32.mrb[24].mxu1 }
 0x3e2   : > { %v1275_v11 = vadd.f32 %v2209_v10, %v1969_v60  ;;  %v1266_v12 = vpop.f32.mrb[25].mxu1 }
 0x3e3   : > { %v1267_v13 = vadd.f32 %v1969_v60, %v1266_v12  ;;  %v2210_v14 = vpop.f32.mrb[26].mxu1 }
 0x3e4   : > { %v1278_v15 = vadd.f32 %v2210_v14, %v1969_v60  ;;  %v1269_v16 = vpop.f32.mrb[27].mxu1  ;;  %v1319_v18 = vmax.f32 %v1275_v11, 0.0 }
 0x3e5   : > { %v1270_v17 = vadd.f32 %v1969_v60, %v1269_v16  ;;  %v1317_v20 = vmax.f32 %v1267_v13, 0.0 }
 0x3e6   : > { %v1320_v19 = vmax.f32 %v1278_v15, 0.0 }
 0x3e7   : > { %v1318_v21 = vmax.f32 %v1270_v17, 0.0 }
 0x3e8   : > { %v1332_v22 = vpack.c.bf16 %v1320_v19, %v1319_v18 }
 0x3e9   : > { %v1331_v23 = vpack.c.bf16 %v1318_v21, %v1317_v20 }
 0x3eb   : > { %2227 = vmatprep.mubr.msk.bf16.mxu0 %vm1023_vm1, %v1331_v23 }
 0x3ec   : > { %2228 = vmatmul.mubr.msk.bf16.gmra.mrb[48].mxu0 %vm1023_vm1, %v1332_v22 }
 0x3f1   : > { %v2213_v24 = vpop.f32.mrb[28].mxu1 }
 0x3f2   : > { %v1291_v25 = vadd.f32 %v2213_v24, %v1969_v60  ;;  %v1282_v26 = vpop.f32.mrb[29].mxu1 }
 0x3f3   : > { %v1283_v27 = vadd.f32 %v1969_v60, %v1282_v26  ;;  %v2214_v28 = vpop.f32.mrb[30].mxu1 }
 0x3f4   : > { %v1294_v29 = vadd.f32 %v2214_v28, %v1969_v60  ;;  %v1285_v30 = vpop.f32.mrb[31].mxu1  ;;  %v1323_v32 = vmax.f32 %v1291_v25, 0.0 }
 0x3f5   : > { %v1286_v31 = vadd.f32 %v1969_v60, %v1285_v30  ;;  %v1321_v34 = vmax.f32 %v1283_v27, 0.0 }
 0x3f6   : > { %v1324_v33 = vmax.f32 %v1294_v29, 0.0 }
 0x3f7   : > { %v1322_v35 = vmax.f32 %v1286_v31, 0.0 }
 0x3f8   : > { %v1334_v36 = vpack.c.bf16 %v1324_v33, %v1323_v32 }
 0x3f9   : > { %v1333_v38 = vpack.c.bf16 %v1322_v35, %v1321_v34 }
 0x3fb   : > { %2231 = vmatprep.mubr.msk.bf16.mxu0 %vm1023_vm1, %v1333_v38 }
 0x3fc   : > { %2232 = vmatmul.mubr.msk.bf16.gmra.mrb[52].mxu0 %vm1023_vm1, %v1334_v36 }
 0x401   : > { %v2217_v39 = vpop.f32.mrb[32].mxu1 }
 0x402   : > { %v1307_v40 = vadd.f32 %v2217_v39, %v1969_v60  ;;  %v1298_v41 = vpop.f32.mrb[33].mxu1 }
 0x403   : > { %v1299_v42 = vadd.f32 %v1969_v60, %v1298_v41  ;;  %v2218_v43 = vpop.f32.mrb[34].mxu1 }
 0x404   : > { %v1310_v44 = vadd.f32 %v2218_v43, %v1969_v60  ;;  %v1301_v45 = vpop.f32.mrb[35].mxu1  ;;  %v1327_v47 = vmax.f32 %v1307_v40, 0.0 }
 0x405   : > { %v1302_v46 = vadd.f32 %v1969_v60, %v1301_v45  ;;  %v1325_v49 = vmax.f32 %v1299_v42, 0.0 }
 0x406   : > { %v1328_v48 = vmax.f32 %v1310_v44, 0.0 }
 0x407   : > { %v1326_v50 = vmax.f32 %v1302_v46, 0.0 }
 0x408   : > { %v1336_v51 = vpack.c.bf16 %v1328_v48, %v1327_v47 }
 0x409   : > { %v1335_v52 = vpack.c.bf16 %v1326_v50, %v1325_v49  ;;  %v1515_v49 = vlaneseq }
 0x40b   : > { %2235 = vmatprep.mubr.msk.bf16.mxu0 %vm1023_vm1, %v1335_v52  ;;  %v1516_v50 = vshrl.u32 %v1515_v49, 7  ;;  %v1513_v52 = vld [vmem:[%s2970_s12] sm:$0x3] }
 0x40c   : > { %2236 = vmatmul.mubr.msk.bf16.gmra.mrb[56].mxu0 %vm1023_vm1, %v1336_v51 }
 0x40d   : > { %v1517_v51 = vsub.s32 0, %v1516_v50  ;;  %v1521_v53 = vsub.s32 1, %v1516_v50 }
 0x40f   : > { %v2852_v54 = vrot.slane %v1513_v52, %v1517_v51 }
 0x4af   : > { %v2225_v57 = vpop.f32.mrb[44].mxu0 }
 0x4b0   : > { %v1427_v58 = vadd.f32 %v2225_v57, %v1980_v56  ;;  %v1418_v59 = vpop.f32.mrb[45].mxu0 }
 0x4b1   : > { %v1419_v60 = vadd.f32 %v1980_v56, %v1418_v59  ;;  %v2226_v61 = vpop.f32.mrb[46].mxu0 }
 0x4b2   : > { %v1430_v62 = vadd.f32 %v2226_v61, %v1980_v56  ;;  %v1421_v63 = vpop.f32.mrb[47].mxu0  ;;  %v1483_v0 = vmax.f32 %v1427_v58, 0.0 }
 0x4b3   : > { %v1422_v37 = vadd.f32 %v1980_v56, %v1421_v63  ;;  %v1481_v2 = vmax.f32 %v1419_v60, 0.0 }
 0x4b4   : > { %v1484_v1 = vmax.f32 %v1430_v62, 0.0 }
 0x4b5   : > { %v1482_v3 = vmax.f32 %v1422_v37, 0.0 }
 0x4b6   : > { %v1498_v4 = vpack.c.bf16 %v1484_v1, %v1483_v0 }
 0x4b7   : > { %v1497_v5 = vpack.c.bf16 %v1482_v3, %v1481_v2 }
 0x4b9   : > { %1999 = vmatmul.mubr.msk.bf16.vlgmr.msra.gmra.mrb[36].mxu1 %vm854_vm0, %v1497_v5 }
 0x4ba   : > { %1631 = vmatprep.mubr.bf16.mxu1 %v2461_v55 }
 0x4bf   : > { %v2229_v6 = vpop.f32.mrb[48].mxu0 }
 0x4c0   : > { %v1443_v7 = vadd.f32 %v2229_v6, %v1980_v56  ;;  %v1434_v8 = vpop.f32.mrb[49].mxu0 }
 0x4c1   : > { %v1435_v9 = vadd.f32 %v1980_v56, %v1434_v8  ;;  %v2230_v10 = vpop.f32.mrb[50].mxu0  ;;  %2000 = vmatmul.mubr.msk.bf16.gmra.mrb[40].mxu1 %vm854_vm0, %v1498_v4 }
 0x4c2   : > { %v1446_v11 = vadd.f32 %v2230_v10, %v1980_v56  ;;  %v1437_v12 = vpop.f32.mrb[51].mxu0  ;;  %1641 = vmatprep.mubr.bf16.mxu1 %v2461_v55  ;;  %v1487_v14 = vmax.f32 %v1443_v7, 0.0 }
 0x4c3   : > { %v1438_v13 = vadd.f32 %v1980_v56, %v1437_v12  ;;  %v1485_v16 = vmax.f32 %v1435_v9, 0.0 }
 0x4c4   : > { %v1488_v15 = vmax.f32 %v1446_v11, 0.0 }
 0x4c5   : > { %v1486_v17 = vmax.f32 %v1438_v13, 0.0 }
 0x4c6   : > { %v1500_v18 = vpack.c.bf16 %v1488_v15, %v1487_v14 }
 0x4c7   : > { %v1499_v19 = vpack.c.bf16 %v1486_v17, %v1485_v16 }
 0x4c9   : > { %2001 = vmatmul.mubr.msk.bf16.gmra.mrb[44].mxu1 %vm854_vm0, %v1499_v19 }
 0x4ca   : > { %1651 = vmatprep.mubr.bf16.mxu1 %v2461_v55 }
 0x4cf   : > { %v2233_v20 = vpop.f32.mrb[52].mxu0 }
 0x4d0   : > { %v1459_v21 = vadd.f32 %v2233_v20, %v1980_v56  ;;  %v1450_v22 = vpop.f32.mrb[53].mxu0 }
 0x4d1   : > { %v1451_v23 = vadd.f32 %v1980_v56, %v1450_v22  ;;  %v2234_v24 = vpop.f32.mrb[54].mxu0  ;;  %2002 = vmatmul.mubr.msk.bf16.gmra.mrb[48].mxu1 %vm854_vm0, %v1500_v18 }
 0x4d2   : > { %v1462_v25 = vadd.f32 %v2234_v24, %v1980_v56  ;;  %v1453_v26 = vpop.f32.mrb[55].mxu0  ;;  %1661 = vmatprep.mubr.bf16.mxu1 %v2461_v55  ;;  %v1491_v28 = vmax.f32 %v1459_v21, 0.0 }
 0x4d3   : > { %v1454_v27 = vadd.f32 %v1980_v56, %v1453_v26  ;;  %v1489_v30 = vmax.f32 %v1451_v23, 0.0 }
 0x4d4   : > { %v1492_v29 = vmax.f32 %v1462_v25, 0.0 }
 0x4d5   : > { %v1490_v31 = vmax.f32 %v1454_v27, 0.0 }
 0x4d6   : > { %v1502_v32 = vpack.c.bf16 %v1492_v29, %v1491_v28 }
 0x4d7   : > { %v1501_v33 = vpack.c.bf16 %v1490_v31, %v1489_v30 }
 0x4d9   : > { %2003 = vmatmul.mubr.msk.bf16.gmra.mrb[52].mxu1 %vm854_vm0, %v1501_v33 }
 0x4da   : > { %1671 = vmatprep.mubr.bf16.mxu1 %v2461_v55 }
 0x4df   : > { %v2237_v34 = vpop.f32.mrb[56].mxu0 }
 0x4e0   : > { %v1475_v35 = vadd.f32 %v2237_v34, %v1980_v56  ;;  %v1466_v36 = vpop.f32.mrb[57].mxu0 }
 0x4e1   : > { %v1467_v38 = vadd.f32 %v1980_v56, %v1466_v36  ;;  %v2238_v39 = vpop.f32.mrb[58].mxu0  ;;  %2004 = vmatmul.mubr.msk.bf16.gmra.mrb[56].mxu1 %vm854_vm0, %v1502_v32 }
 0x4e2   : > { %v1478_v40 = vadd.f32 %v2238_v39, %v1980_v56  ;;  %v1469_v41 = vpop.f32.mrb[59].mxu0  ;;  %1681 = vmatprep.mubr.bf16.mxu1 %v2461_v55  ;;  %v1495_v43 = vmax.f32 %v1475_v35, 0.0 }
 0x4e3   : > { %v1470_v42 = vadd.f32 %v1980_v56, %v1469_v41  ;;  %v1493_v45 = vmax.f32 %v1467_v38, 0.0  ;;  %v2854_v56 = vrot.slane %v1513_v52, %v1521_v53 }
 0x4e4   : > { %v1496_v44 = vmax.f32 %v1478_v40, 0.0 }
 0x4e5   : > { %v1494_v46 = vmax.f32 %v1470_v42, 0.0 }
 0x4e6   : > { %v1504_v47 = vpack.c.bf16 %v1496_v44, %v1495_v43 }
 0x4e7   : > { %v1503_v48 = vpack.c.bf16 %v1494_v46, %v1493_v45 }
 0x4e9   : > { %2005 = vmatmul.mubr.msk.bf16.gmra.mrb[60].mxu1 %vm854_vm0, %v1503_v48 }
 0x4ea   : > { %1691 = vmatprep.mubr.bf16.mxu1 %v2461_v55 }
 0x4f1   : > { %2006 = vmatmul.mubr.msk.bf16.gmra.mrb[64].mxu1 %vm854_vm0, %v1504_v47 }
 0x58c   : > { %v1623_v57 = vpop.f32.mrb[36].mxu1 }
 0x58d   : > { %v1624_v58 = vadd.f32 %v1623_v57, %v2852_v54  ;;  %v1625_v59 = vpop.f32.mrb[37].mxu1 }
 0x58e   : > { %v1626_v55 = vadd.f32 %v1625_v59, %v2854_v56  ;;  %v1627_v60 = vpop.f32.mrb[38].mxu1 }
 0x58f   : > { %v1628_v61 = vadd.f32 %v1627_v60, %v2852_v54  ;;  %v1629_v62 = vpop.f32.mrb[39].mxu1 }
 0x590   : > { %v2031_v63 = vpack.c.bf16 %v1626_v55, %v1624_v58  ;;  %v1630_v37 = vadd.f32 %v1629_v62, %v2854_v56 }
 0x592   : > { %1798 = vst [vmem:[%s2862_s24] sm:$0xff] %v2031_v63  ;;  %v2032_v0 = vpack.c.bf16 %v1630_v37, %v1628_v61 }
 0x594   : > { %1799 = vst [vmem:[%s2862_s24 + $0x8] sm:$0xff] %v2032_v0  ;;  %v1633_v1 = vpop.f32.mrb[40].mxu1 }
 0x595   : > { %v1634_v2 = vadd.f32 %v1633_v1, %v2852_v54  ;;  %v1635_v3 = vpop.f32.mrb[41].mxu1 }
 0x596   : > { %v1636_v4 = vadd.f32 %v1635_v3, %v2854_v56  ;;  %v1637_v5 = vpop.f32.mrb[42].mxu1 }
 0x597   : > { %v1638_v6 = vadd.f32 %v1637_v5, %v2852_v54  ;;  %v1639_v7 = vpop.f32.mrb[43].mxu1 }
 0x598   : > { %v2033_v8 = vpack.c.bf16 %v1636_v4, %v1634_v2  ;;  %v1640_v9 = vadd.f32 %v1639_v7, %v2854_v56 }
 0x59a   : > { %1800 = vst [vmem:[%s2862_s24 + $0x10] sm:$0xff] %v2033_v8  ;;  %v2034_v10 = vpack.c.bf16 %v1640_v9, %v1638_v6 }
 0x59c   : > { %1801 = vst [vmem:[%s2862_s24 + $0x18] sm:$0xff] %v2034_v10  ;;  %v1643_v11 = vpop.f32.mrb[44].mxu1 }
 0x59d   : > { %v1644_v12 = vadd.f32 %v1643_v11, %v2852_v54  ;;  %v1645_v13 = vpop.f32.mrb[45].mxu1 }
 0x59e   : > { %v1646_v14 = vadd.f32 %v1645_v13, %v2854_v56  ;;  %v1647_v15 = vpop.f32.mrb[46].mxu1 }
 0x59f   : > { %v1648_v16 = vadd.f32 %v1647_v15, %v2852_v54  ;;  %v1649_v17 = vpop.f32.mrb[47].mxu1 }
 0x5a0   : > { %v2035_v18 = vpack.c.bf16 %v1646_v14, %v1644_v12  ;;  %v1650_v19 = vadd.f32 %v1649_v17, %v2854_v56 }
 0x5a2   : > { %1802 = vst [vmem:[%s2862_s24 + $0x20] sm:$0xff] %v2035_v18  ;;  %v2036_v20 = vpack.c.bf16 %v1650_v19, %v1648_v16 }
 0x5a4   : > { %1803 = vst [vmem:[%s2862_s24 + $0x28] sm:$0xff] %v2036_v20  ;;  %v1653_v21 = vpop.f32.mrb[48].mxu1 }
 0x5a5   : > { %v1654_v22 = vadd.f32 %v1653_v21, %v2852_v54  ;;  %v1655_v23 = vpop.f32.mrb[49].mxu1 }
 0x5a6   : > { %v1656_v24 = vadd.f32 %v1655_v23, %v2854_v56  ;;  %v1657_v25 = vpop.f32.mrb[50].mxu1 }
 0x5a7   : > { %v1658_v26 = vadd.f32 %v1657_v25, %v2852_v54  ;;  %v1659_v27 = vpop.f32.mrb[51].mxu1 }
 0x5a8   : > { %v2037_v28 = vpack.c.bf16 %v1656_v24, %v1654_v22  ;;  %v1660_v29 = vadd.f32 %v1659_v27, %v2854_v56 }
 0x5aa   : > { %1804 = vst [vmem:[%s2862_s24 + $0x30] sm:$0xff] %v2037_v28  ;;  %v2038_v30 = vpack.c.bf16 %v1660_v29, %v1658_v26 }
 0x5ac   : > { %1805 = vst [vmem:[%s2862_s24 + $0x38] sm:$0xff] %v2038_v30  ;;  %v1663_v31 = vpop.f32.mrb[52].mxu1 }
 0x5ad   : > { %v1664_v32 = vadd.f32 %v1663_v31, %v2852_v54  ;;  %v1665_v33 = vpop.f32.mrb[53].mxu1 }
 0x5ae   : > { %v1666_v34 = vadd.f32 %v1665_v33, %v2854_v56  ;;  %v1667_v35 = vpop.f32.mrb[54].mxu1 }
 0x5af   : > { %v1668_v36 = vadd.f32 %v1667_v35, %v2852_v54  ;;  %v1669_v38 = vpop.f32.mrb[55].mxu1 }
 0x5b0   : > { %v2039_v39 = vpack.c.bf16 %v1666_v34, %v1664_v32  ;;  %v1670_v40 = vadd.f32 %v1669_v38, %v2854_v56 }
 0x5b2   : > { %1806 = vst [vmem:[%s2862_s24 + $0x40] sm:$0xff] %v2039_v39  ;;  %v2040_v41 = vpack.c.bf16 %v1670_v40, %v1668_v36 }
 0x5b4   : > { %1807 = vst [vmem:[%s2862_s24 + $0x48] sm:$0xff] %v2040_v41  ;;  %v1673_v42 = vpop.f32.mrb[56].mxu1 }
 0x5b5   : > { %v1674_v43 = vadd.f32 %v1673_v42, %v2852_v54  ;;  %v1675_v44 = vpop.f32.mrb[57].mxu1 }
 0x5b6   : > { %v1676_v45 = vadd.f32 %v1675_v44, %v2854_v56  ;;  %v1677_v46 = vpop.f32.mrb[58].mxu1 }
 0x5b7   : > { %v1678_v47 = vadd.f32 %v1677_v46, %v2852_v54  ;;  %v1679_v48 = vpop.f32.mrb[59].mxu1 }
 0x5b8   : > { %v2041_v49 = vpack.c.bf16 %v1676_v45, %v1674_v43  ;;  %v1680_v50 = vadd.f32 %v1679_v48, %v2854_v56 }
 0x5ba   : > { %1808 = vst [vmem:[%s2862_s24 + $0x50] sm:$0xff] %v2041_v49  ;;  %v2042_v51 = vpack.c.bf16 %v1680_v50, %v1678_v47 }
 0x5bc   : > { %1809 = vst [vmem:[%s2862_s24 + $0x58] sm:$0xff] %v2042_v51  ;;  %v1683_v52 = vpop.f32.mrb[60].mxu1 }
 0x5bd   : > { %v1684_v53 = vadd.f32 %v1683_v52, %v2852_v54  ;;  %v1685_v57 = vpop.f32.mrb[61].mxu1 }
 0x5be   : > { %v1686_v58 = vadd.f32 %v1685_v57, %v2854_v56  ;;  %v1687_v59 = vpop.f32.mrb[62].mxu1 }
 0x5bf   : > { %v1688_v55 = vadd.f32 %v1687_v59, %v2852_v54  ;;  %v1689_v60 = vpop.f32.mrb[63].mxu1 }
 0x5c0   : > { %v2043_v61 = vpack.c.bf16 %v1686_v58, %v1684_v53  ;;  %v1690_v62 = vadd.f32 %v1689_v60, %v2854_v56 }
 0x5c2   : > { %1810 = vst [vmem:[%s2862_s24 + $0x60] sm:$0xff] %v2043_v61  ;;  %v2044_v63 = vpack.c.bf16 %v1690_v62, %v1688_v55 }
 0x5c4   : > { %1811 = vst [vmem:[%s2862_s24 + $0x68] sm:$0xff] %v2044_v63  ;;  %v1693_v37 = vpop.f32.mrb[64].mxu1 }
 0x5c5   : > { %v1694_v0 = vadd.f32 %v1693_v37, %v2852_v54  ;;  %v1695_v1 = vpop.f32.mrb[65].mxu1 }
 0x5c6   : > { %v1696_v2 = vadd.f32 %v1695_v1, %v2854_v56  ;;  %v1697_v3 = vpop.f32.mrb[66].mxu1 }
 0x5c7   : > { %v1698_v4 = vadd.f32 %v1697_v3, %v2852_v54  ;;  %v1699_v5 = vpop.f32.mrb[67].mxu1 }
 0x5c8   : > { %v2045_v6 = vpack.c.bf16 %v1696_v2, %v1694_v0  ;;  %v1700_v7 = vadd.f32 %v1699_v5, %v2854_v56 }
 0x5ca   : > { %1812 = vst [vmem:[%s2862_s24 + $0x70] sm:$0xff] %v2045_v6  ;;  %v2046_v8 = vpack.c.bf16 %v1700_v7, %v1698_v4 }
 0x5cc   : > { %1813 = vst [vmem:[%s2862_s24 + $0x78] sm:$0xff] %v2046_v8 }
 0x5cd   : > { %2403 = shalt.err (!%p2400_p1)
}
 0x5ce   : > { %s2404_s15 = scalar_lea.hbm %s2911_s18, 2048  ;;  %s2408_s25 = scalar_lea.hbm %s2971_s13, 8192 }
 0x5cf   : > { %p2405_p3 = scmp.ne.s32.totalorder %s2911_s18, %s2404_s15  ;;  %p2409_p0 = scmp.lt.u32.totalorder %s2911_s18, %s2971_s13 }
 0x5d0   : > { %p2410_p2 = scmp.lt.u32.totalorder %s2408_s25, %s2404_s15  ;;  %p2412_p6 = scmp.lt.u32.totalorder %s2404_s15, %s2911_s18 }
 0x5d1   : > { %p2406_p4 = pnand %p2405_p3, %p2988_p10 }
 0x5d2   : > { %p2411_p7 = por %p2410_p2, %p2409_p0 }
 0x5d3   : > { %p2407_p5 = pneg %p2406_p4 }
 0x5d4   : > { %p2413_p11 = por %p2412_p6, %p2411_p7 }
 0x5d6   : > { %p2414_p12 = pnand %p2413_p11, %p2407_p5 }
 0x5d8   : > { %2417 = shalt.err (!%p2414_p12)
}
 0x5d9   : > { %s2463_s14 = smov 128   ;;  %s2464_s16 = smov 8  }
 0x5da   : > { %2249 = dma.vmem_to_hbm [thread:$0]  (%p2988_p10), %s2913_s23, 2048, %s2911_s18, %s1815_s29, %s2463_s14, %s2463_s14, %s2464_s16  }
 0x5db PF: > { %s2989_s22 = sld [smem:[#allocation8_spill]]  ;;  %p2260_p8 = scmp.ge.s32.totalorder %s2456_s28, 2 }
 0x5dc   : > { %p2990_p9 = scmp.ne.s32.totalorder %s2985_s21, 0 }
 0x5de   : > { %p2256_p13 = pnand %p2260_p8, %p2990_p9 }
 0x5e1   : > { %s1844_s24 = sand.u32 1, %s2989_s22  }
 0x5e2   : > { %s1845_s15 = scalar_lea.sflag [#allocation4], %s1844_s24 }
 0x5e3   : > { %2439 = dma.done.wait (!%p2256_p13), %s1845_s15, 2048  }
 0x5e4   : > { %2441 = vsyncadd (!%p2256_p13), %s1845_s15, 4294965248  ;;  %s2991_s28 = sld [smem:[#allocation10_spill]]  ;;  %s2992_s19 = sld [smem:[#allocation9_spill]] }
 0x5e5   : > { %s2993_s27 = sld [smem:[#allocation11_spill]]  ;;  %s2994_s25 = smov %s2448_s26 }
 0x5ea   : > { %p26_p1 = scmp.ge.s32.totalorder %s2991_s28, 6   ;;  %s2995_s26 = smov %s2992_s19 }
 0x5ec   :  { %28 = sbr.rel (!%p26_p1) target bundleno = 5 (0x5), region = 117 }
 0x5f3   :  { %1850 = vsyncpa [#allocation3], 1 }
 0x5f4   :  { %1852 = vsyncpa [#allocation3 + $0x1], 1 }
 0x5f5   :  { %1853 = vsyncpa [#allocation4], 1 }
 0x5f6   :  { %1855 = vsyncpa [#allocation4 + $0x1], 1 }

// kernel: tpu_custom_call.1
= control target key start
LH: loop header
LB: loop body
LE: loop exit
PB: predicated region body
PF: predicated region fallthrough
CT: control target
= control target key end

     0   :  { %18 = vsyncpa [#allocation3], 0  ;;  %s2958_s0 = inlined_call_operand.hbm [shape: bf16[512,256], index: 0, kind: input, shape index: {}]   ;;  %s2959_s1 = inlined_call_operand.vmem [shape: bf16[256,64], index: 1, kind: input, shape index: {}]   ;;  %s2960_s2 = inlined_call_operand.vmem [shape: f32[1,64], index: 2, kind: input, shape index: {}]   ;;  %s2961_s3 = inlined_call_operand.vmem [shape: bf16[64,32], index: 3, kind: input, shape index: {}]   ;;  %s2962_s4 = inlined_call_operand.vmem [shape: f32[1,32], index: 4, kind: input, shape index: {}]   ;;  %s2963_s5 = inlined_call_operand.vmem [shape: bf16[32,32], index: 5, kind: input, shape index: {}]   ;;  %s2964_s6 = inlined_call_operand.vmem [shape: f32[1,32], index: 6, kind: input, shape index: {}]   ;;  %s2965_s7 = inlined_call_operand.vmem [shape: bf16[32,32], index: 7, kind: input, shape index: {}]   ;;  %s2966_s8 = inlined_call_operand.vmem [shape: f32[1,32], index: 8, kind: input, shape index: {}]   ;;  %s2967_s9 = inlined_call_operand.vmem [shape: bf16[32,64], index: 9, kind: input, shape index: {}]   ;;  %s2968_s10 = inlined_call_operand.vmem [shape: f32[1,64], index: 10, kind: input, shape index: {}]   ;;  %s2969_s11 = inlined_call_operand.vmem [shape: bf16[64,256], index: 11, kind: input, shape index: {}]   ;;  %s2970_s12 = inlined_call_operand.vmem [shape: f32[1,256], index: 12, kind: input, shape index: {}]   ;;  %s2971_s13 = inlined_call_operand.hbm [shape: bf16[512,256], index: 13, kind: output, shape index: {}]  }
   0x1   :  { %20 = vsyncpa [#allocation3 + $0x1], 0 }
   0x2   :  { %21 = vsyncpa [#allocation4], 0 }
   0x3   :  { %23 = vsyncpa [#allocation4 + $0x1], 0  ;;  %s2535_s25 = smov 0   ;;  %s2537_s26 = smov 0  }
   0x4   :  { %s2539_s27 = smov 0   ;;  %s2541_s28 = smov 0  }
   0x5 LB: > { %2978 = sst [smem:[#allocation8_spill]] %s2444_s25  ;;  %s2556_s29 = sadd.s32 4294967295, %s2456_s28   ;;  %s2456_s28 = sphi %s2541_s28, %s2991_s28   ;;  %s2452_s27 = sphi %s2539_s27, %s2993_s27   ;;  %s2448_s26 = sphi %s2537_s26, %s2995_s26   ;;  %s2444_s25 = sphi %s2535_s25, %s2994_s25  }
   0x6   : > { %2979 = sst [smem:[#allocation9_spill]] %s2452_s27  ;;  %s1902_s30 = sadd.s32 4294967294, %s2456_s28  }
   0x7   : > { %s2560_s14 = sadd.s32 1, %s2456_s28   ;;  %s36_s15 = sadd.s32 1, %s2452_s27 }
   0x8   : > { %2980 = sst [smem:[#allocation10_spill]] %s2560_s14  ;;  %s33_s16 = ssub.s32 %s2456_s28, %s2560_s14 }
   0x9   : > { %p43_p0 = scmp.ne.s32.totalorder %s2452_s27, %s2448_s26  ;;  %p34_p1 = scmp.eq.s32.totalorder %s33_s16, 0 }
   0xa   : > { %p44_p2 = scmp.eq.s32.totalorder %s2456_s28, 0  ;;  %p49_p3 = scmp.ne.s32.totalorder %s2448_s26, %s2444_s25 }
   0xb   : > { %p50_p4 = scmp.eq.s32.totalorder %s2556_s29, 0  ;;  %p325_p7 = scmp.eq.s32.totalorder %s2556_s29, 3 }
   0xc   : > { %s2572_s17 = scalar_select %p34_p1, %s2452_s27, %s36_s15  }
   0xd   : > { %p2574_p5 = por %p44_p2, %p43_p0  ;;  %p2578_p6 = por %p50_p4, %p49_p3 }
   0xe   : > { %2981 = sst [smem:[#allocation11_spill]] %s2572_s17  ;;  %p331_p8 = scmp.eq.s32.totalorder %s1902_s30, 3 }
   0xf   : > { %p2259_p9 = scmp.lt.s32.totalorder %s2456_s28, 4  ;;  %p2584_p10 = por %p325_p7, %p43_p0 }
  0x10   : > { %p2588_p11 = por %p331_p8, %p49_p3  ;;  %s387_s22 = sand.u32 1, %s2452_s27  }
  0x11   : > { %s2984_s20 = scalar_select %p2584_p10, 1, 0 }
  0x12   : > { %s2985_s21 = scalar_select %p2588_p11, 1, 0 }
  0x13   : > { %s2030_s23 = sshll.u32 %s2456_s28, 11  ;;  %s1905_s24 = sshll.u32 %s387_s22, 7 }
  0x14   : > { %s2597_s17 = scalar_lea.hbm %s2958_s0, %s2030_s23  ;;  %s391_s30 = scalar_lea.vmem [#allocation2], %s1905_s24 }
  0x15   : > { %s399_s14 = sshll.u32 %s391_s30, 4  ;;  %p2601_p12 = pnand %p2259_p9, %p2574_p5  ;;  %s2605_s14 = int_to_ptr.vmem [resolvable:$true] %s399_s14 }
  0x16   : > { %s2607_s27 = scalar_lea.sflag [#allocation3], %s387_s22  ;;  %s2360_s15 = scalar_lea.hbm %s2597_s17, 2048 }
  0x17   : > { %p2361_p13 = scmp.ne.s32.totalorder %s2597_s17, %s2360_s15  ;;  %p2362_p0 = pneg %p2601_p12 }
  0x18   : > { %s2365_s24 = scalar_lea.hbm %s2958_s0, 8192  ;;  %p2366_p3 = scmp.lt.u32.totalorder %s2597_s17, %s2958_s0 }
  0x19   : > { %p2363_p1 = pnand %p2362_p0, %p2361_p13  ;;  %p2367_p4 = scmp.lt.u32.totalorder %s2365_s24, %s2360_s15 }
  0x1a   : > { %p2369_p7 = scmp.lt.u32.totalorder %s2360_s15, %s2597_s17 }
  0x1b   : > { %p2364_p2 = pneg %p2363_p1  ;;  %p2368_p5 = por %p2367_p4, %p2366_p3 }
  0x1d   : > { %p2370_p8 = por %p2369_p7, %p2368_p5 }
  0x1f   : > { %p2371_p9 = pnand %p2370_p8, %p2364_p2 }
  0x21   : > { %2374 = shalt.err (!%p2371_p9)
}
  0x22   : > { %s2375_s22 = scalar_lea.vmem %s2605_s14, 2048  ;;  %s2458_s23 = smov [#allocation2]  }
  0x23   : > { %p2376_p13 = scmp.ne.s32.totalorder %s2605_s14, %s2375_s22  ;;  %s2380_s18 = sshll.u32 %s2458_s23, 4  ;;  %s2381_s18 = int_to_ptr.vmem [resolvable:$false] %s2380_s18 }
  0x24   : > { %s2382_s16 = scalar_lea.vmem %s2381_s18, 4096  ;;  %p2383_p10 = scmp.lt.s32.totalorder %s2605_s14, %s2381_s18 }
  0x25   : > { %p2378_p1 = pnand %p2376_p13, %p2362_p0  ;;  %p2384_p3 = scmp.lt.s32.totalorder %s2382_s16, %s2375_s22 }
  0x27   : > { %p2379_p11 = pneg %p2378_p1  ;;  %p2385_p4 = por %p2384_p3, %p2383_p10 }
  0x29   : > { %p2386_p5 = pnand %p2385_p4, %p2379_p11 }
  0x2b   : > { %2389 = shalt.err (!%p2386_p5)
}
  0x2c   : > { %s2459_s15 = smov 128   ;;  %s2460_s24 = smov 8  }
  0x2d   : > { %2254 = dma.hbm_to_vmem [thread:$0]  (!%p2601_p12), %s2597_s17, 2048, %s2605_s14, %s2607_s27, %s2459_s15, %s2459_s15, %s2460_s24  }
  0x2e   : > { %p1909_p0 = scmp.ge.s32.totalorder %s2456_s28, 1  ;;  %p407_p2 = scmp.lt.s32.totalorder %s2456_s28, 5 }
  0x30   : > { %p408_p7 = pnand %p1909_p0, %p407_p2 }
  0x31   : > { %s2638_s30 = sand.u32 (!%p408_p7), 1, %s2448_s26  }
  0x32   : > { %411 = sbr.rel (%p408_p7) target bundleno = 1499 (0x5db), region = 72  ;;  %s2977_s22 = sshll.u32 (!%p408_p7), %s2638_s30, 7 }
  0x33   : > { %s414_s23 = scalar_lea.sflag (!%p408_p7), [#allocation3], %s2638_s30  ;;  %s2644_s18 = scalar_lea.vmem (!%p408_p7), [#allocation2], %s2977_s22 }
  0x39   : > { %2435 = dma.done.wait (%p2578_p6), %s414_s23, 2048  }
  0x3a   : > { %2437 = vsyncadd (%p2578_p6), %s414_s23, 4294965248  ;;  %v2298_v0 = vld [vmem:[%s2959_s1 + $0x40] sm:$0xff]   ;;  %v2300_v2 = vld [vmem:[%s2959_s1 + $0x48] sm:$0xff]   ;;  %vm854_vm0 = vcmask 523264   ;;  %vm1023_vm1 = vcmask 261120   ;;  %s2987_s15 = sshll.u32 %s2638_s30, 7 }
  0x3b   : > { %v2299_v1 = vld [vmem:[%s2959_s1] sm:$0xff]   ;;  %2049 = vmatprep.subr.bf16.mxu0 %v2298_v0  ;;  %v2301_v3 = vld [vmem:[%s2959_s1 + $0x8] sm:$0xff]   ;;  %v2302_v4 = vld [vmem:[%s2959_s1 + $0x50] sm:$0xff]   ;;  %s2862_s24 = scalar_lea.vmem [#allocation5], %s2987_s15  ;;  %s2048_s19 = sshll.u32 %s2556_s29, 11 }
  0x3c   : > { %2050 = vmatpush3.bf16.msra.mxu0 %v2299_v1  ;;  %v2303_v5 = vld [vmem:[%s2959_s1 + $0x10] sm:$0xff]   ;;  %v2304_v6 = vld [vmem:[%s2959_s1 + $0x58] sm:$0xff]   ;;  %v2306_v8 = vld [vmem:[%s2959_s1 + $0x60] sm:$0xff]   ;;  %s1829_s23 = sshll.u32 %s2862_s24, 4  ;;  %s1815_s29 = scalar_lea.sflag [#allocation4], %s2638_s30  ;;  %s2913_s23 = int_to_ptr.vmem [resolvable:$true] %s1829_s23 }
  0x3d   : > { %2051 = vmatprep.subr.bf16.mxu0 %v2300_v2  ;;  %v2305_v7 = vld [vmem:[%s2959_s1 + $0x18] sm:$0xff]   ;;  %v2307_v9 = vld [vmem:[%s2959_s1 + $0x20] sm:$0xff]   ;;  %v2308_v10 = vld [vmem:[%s2959_s1 + $0x68] sm:$0xff]   ;;  %s2390_s14 = scalar_lea.vmem %s2913_s23, 2048  ;;  %p2988_p10 = scmp.ne.s32.totalorder %s2984_s20, 0 }
  0x3e   : > { %v2316_v11 = vld [vmem:[%s2644_s18 + $0x4] ss:$8 sps:$4 sm:$0xff]   ;;  %v2310_v13 = vld [vmem:[%s2959_s1 + $0x70] sm:$0xff]   ;;  %v2312_v15 = vld [vmem:[%s2959_s1 + $0x78] sm:$0xff]   ;;  %p2391_p6 = scmp.ne.s32.totalorder %s2913_s23, %s2390_s14  ;;  %s2462_s17 = smov [#allocation5]  }
  0x3f   : > { %v2309_v12 = vld [vmem:[%s2959_s1 + $0x28] sm:$0xff]   ;;  %726 = vmatprep.mubr.bf16.mxu0 %v2316_v11  ;;  %v2311_v14 = vld [vmem:[%s2959_s1 + $0x30] sm:$0xff]   ;;  %v2313_v16 = vld [vmem:[%s2959_s1 + $0x38] sm:$0xff]   ;;  %s2394_s16 = sshll.u32 %s2462_s17, 4  ;;  %s2395_s16 = int_to_ptr.vmem [resolvable:$false] %s2394_s16 }
  0x40   : > { %2052 = vmatpush3.bf16.msra.mxu0 %v2301_v3  ;;  %v2338_v17 = vld [vmem:[%s2961_s3] sm:$0xff]   ;;  %v2317_v19 = vld [vmem:[%s2644_s18 + $0x14] ss:$8 sps:$4 sm:$0xff]   ;;  %v2339_v20 = vld [vmem:[%s2961_s3 + $0x8] sm:$0xff]   ;;  %p2392_p11 = pnand %p2391_p6, %p2988_p10  ;;  %s2396_s22 = scalar_lea.vmem %s2395_s16, 4096 }
  0x41   : > { %2053 = vmatprep.subr.bf16.mxu0 %v2302_v4  ;;  %v2314_v18 = vld [vmem:[%s2644_s18] ss:$8 sps:$4 sm:$0xff]   ;;  %2239 = vmatprep.subr.bf16.mxu1 %v2338_v17  ;;  %v2340_v21 = vld [vmem:[%s2961_s3 + $0x10] sm:$0xff]   ;;  %v2320_v23 = vld [vmem:[%s2644_s18 + $0x24] ss:$8 sps:$4 sm:$0xff]   ;;  %p2397_p8 = scmp.lt.s32.totalorder %s2913_s23, %s2395_s16  ;;  %p2398_p9 = scmp.lt.s32.totalorder %s2396_s22, %s2390_s14 }
  0x42   : > { %2243 = vmatpush3.bf16.msra.mxu1 %v2338_v17  ;;  %v2319_v22 = vld [vmem:[%s2644_s18 + $0x10] ss:$8 sps:$4 sm:$0xff]   ;;  %v2322_v24 = vld [vmem:[%s2644_s18 + $0x20] ss:$8 sps:$4 sm:$0xff]   ;;  %v2323_v25 = vld [vmem:[%s2644_s18 + $0x34] ss:$8 sps:$4 sm:$0xff]   ;;  %p2393_p12 = pneg %p2392_p11 }
  0x43   : > { %2240 = vmatprep.subr.bf16.mxu1 %v2339_v20  ;;  %v2325_v26 = vld [vmem:[%s2644_s18 + $0x30] ss:$8 sps:$4 sm:$0xff]   ;;  %v2326_v27 = vld [vmem:[%s2644_s18 + $0x44] ss:$8 sps:$4 sm:$0xff]   ;;  %v2328_v28 = vld [vmem:[%s2644_s18 + $0x40] ss:$8 sps:$4 sm:$0xff]   ;;  %p2399_p13 = por %p2398_p9, %p2397_p8 }
  0x44   : > { %2054 = vmatpush3.bf16.msra.mxu0 %v2303_v5  ;;  %v2329_v29 = vld [vmem:[%s2644_s18 + $0x54] ss:$8 sps:$4 sm:$0xff]   ;;  %v2331_v30 = vld [vmem:[%s2644_s18 + $0x50] ss:$8 sps:$4 sm:$0xff]   ;;  %v2332_v31 = vld [vmem:[%s2644_s18 + $0x64] ss:$8 sps:$4 sm:$0xff]  }
  0x45   : > { %2055 = vmatprep.subr.bf16.mxu0 %v2304_v6  ;;  %v2334_v32 = vld [vmem:[%s2644_s18 + $0x60] ss:$8 sps:$4 sm:$0xff]   ;;  %v2335_v33 = vld [vmem:[%s2644_s18 + $0x74] ss:$8 sps:$4 sm:$0xff]   ;;  %v2337_v34 = vld [vmem:[%s2644_s18 + $0x70] ss:$8 sps:$4 sm:$0xff]   ;;  %s2911_s18 = scalar_lea.hbm %s2971_s13, %s2048_s19  ;;  %p2400_p1 = pnand %p2399_p13, %p2393_p12 }
  0x46   : > { %2244 = vmatpush3.bf16.msra.mxu1 %v2339_v20  ;;  %v2341_v35 = vld [vmem:[%s2961_s3 + $0x18] sm:$0xff]   ;;  %v2729_v37 = vld [vmem:[%s2960_s2] ss:$0 sm:$0xff] }
  0x47   : > { %2241 = vmatprep.subr.bf16.mxu1 %v2340_v21 }
  0x48   : > { %2056 = vmatpush3.bf16.msra.mxu0 %v2305_v7 }
  0x49   : > { %2057 = vmatprep.subr.bf16.mxu0 %v2306_v8 }
  0x4a   : > { %2245 = vmatpush3.bf16.msra.mxu1 %v2340_v21 }
  0x4b   : > { %2242 = vmatprep.subr.bf16.mxu1 %v2341_v35 }
  0x4c   : > { %2058 = vmatpush3.bf16.msra.mxu0 %v2307_v9 }
  0x4d   : > { %2059 = vmatprep.subr.bf16.mxu0 %v2308_v10 }
  0x4e   : > { %2246 = vmatpush3.bf16.msra.mxu1 %v2341_v35 }
  0x50   : > { %2060 = vmatpush3.bf16.msra.mxu0 %v2309_v12 }
  0x51   : > { %2061 = vmatprep.subr.bf16.mxu0 %v2310_v13 }
  0x54   : > { %2062 = vmatpush3.bf16.msra.mxu0 %v2311_v14 }
  0x55   : > { %2063 = vmatprep.subr.bf16.mxu0 %v2312_v15 }
  0x58   : > { %2064 = vmatpush3.bf16.msra.mxu0 %v2313_v16 }
  0x59   : > { %2155 = vmatprep.subr.bf16.mxu0 %v2338_v17 }
  0x5b   : > { %727 = vmatmul.mubr.bf16.vlgmr.msra.gmra.mrb[0].mxu0 %v2314_v18 }
  0x5c   : > { %734 = vmatprep.mubr.bf16.mxu0 %v2317_v19  ;;  %2156 = vmatpush3.bf16.msra.mxu0 %v2338_v17 }
  0x5d   : > { %2157 = vmatprep.subr.bf16.mxu0 %v2339_v20 }
  0x60   : > { %2158 = vmatpush3.bf16.msra.mxu0 %v2339_v20 }
  0x61   : > { %2159 = vmatprep.subr.bf16.mxu0 %v2340_v21 }
  0x63   : > { %735 = vmatmul.mubr.bf16.gmra.mrb[4].mxu0 %v2319_v22 }
  0x64   : > { %742 = vmatprep.mubr.bf16.mxu0 %v2320_v23  ;;  %2160 = vmatpush3.bf16.msra.mxu0 %v2340_v21 }
  0x65   : > { %2161 = vmatprep.subr.bf16.mxu0 %v2341_v35 }
  0x68   : > { %2162 = vmatpush3.bf16.msra.mxu0 %v2341_v35 }
  0x6b   : > { %743 = vmatmul.mubr.bf16.gmra.mrb[8].mxu0 %v2322_v24 }
  0x6c   : > { %750 = vmatprep.mubr.bf16.mxu0 %v2323_v25 }
  0x73   : > { %751 = vmatmul.mubr.bf16.gmra.mrb[12].mxu0 %v2325_v26 }
  0x74   : > { %758 = vmatprep.mubr.bf16.mxu0 %v2326_v27 }
  0x7b   : > { %759 = vmatmul.mubr.bf16.gmra.mrb[16].mxu0 %v2328_v28 }
  0x7c   : > { %766 = vmatprep.mubr.bf16.mxu0 %v2329_v29 }
  0x83   : > { %767 = vmatmul.mubr.bf16.gmra.mrb[20].mxu0 %v2331_v30 }
  0x84   : > { %774 = vmatprep.mubr.bf16.mxu0 %v2332_v31 }
  0x8b   : > { %775 = vmatmul.mubr.bf16.gmra.mrb[24].mxu0 %v2334_v32 }
  0x8c   : > { %782 = vmatprep.mubr.bf16.mxu0 %v2335_v33 }
  0x93   : > { %783 = vmatmul.mubr.bf16.gmra.mrb[28].mxu0 %v2337_v34 }
 0x12e   : > { %v2065_v36 = vpop.f32.mrb[0].mxu0 }
 0x12f   : > { %v2066_v38 = vpop.f32.mrb[1].mxu0 }
 0x130   : > { %v2067_v39 = vadd.f32 %v2066_v38, %v2065_v36  ;;  %v2068_v40 = vpop.f32.mrb[2].mxu0 }
 0x131   : > { %v2069_v41 = vpop.f32.mrb[3].mxu0 }
 0x132   : > { %v729_v42 = vadd.f32 %v2067_v39, %v2729_v37  ;;  %v2070_v43 = vadd.f32 %v2069_v41, %v2068_v40 }
 0x134   : > { %v732_v44 = vadd.f32 %v2070_v43, %v2729_v37  ;;  %v791_v45 = vmax.f32 %v729_v42, 0.0 }
 0x136   : > { %v792_v46 = vmax.f32 %v732_v44, 0.0  ;;  %v2071_v47 = vpop.f32.mrb[4].mxu0 }
 0x137   : > { %v2072_v48 = vpop.f32.mrb[5].mxu0 }
 0x138   : > { %v807_v49 = vpack.c.bf16 %v792_v46, %v791_v45  ;;  %v2073_v50 = vadd.f32 %v2072_v48, %v2071_v47  ;;  %v2074_v51 = vpop.f32.mrb[6].mxu0 }
 0x139   : > { %v2075_v52 = vpop.f32.mrb[7].mxu0 }
 0x13a   : > { %v737_v53 = vadd.f32 %v2073_v50, %v2729_v37  ;;  %v2076_v54 = vadd.f32 %v2075_v52, %v2074_v51  ;;  %2163 = vmatprep.mubr.msk.bf16.mxu0 %vm854_vm0, %v807_v49 }
 0x13c   : > { %v740_v55 = vadd.f32 %v2076_v54, %v2729_v37  ;;  %v793_v56 = vmax.f32 %v737_v53, 0.0 }
 0x13e   : > { %v794_v57 = vmax.f32 %v740_v55, 0.0  ;;  %v2077_v58 = vpop.f32.mrb[8].mxu0 }
 0x13f   : > { %v2078_v59 = vpop.f32.mrb[9].mxu0 }
 0x140   : > { %v808_v60 = vpack.c.bf16 %v794_v57, %v793_v56  ;;  %v2079_v61 = vadd.f32 %v2078_v59, %v2077_v58  ;;  %v2080_v62 = vpop.f32.mrb[10].mxu0 }
 0x141   : > { %v2081_v63 = vpop.f32.mrb[11].mxu0 }
 0x142   : > { %v745_v0 = vadd.f32 %v2079_v61, %v2729_v37  ;;  %v2082_v1 = vadd.f32 %v2081_v63, %v2080_v62  ;;  %2164 = vmatmul.mubr.msk.bf16.vlgmr.msra.gmra.mrb[32].mxu0 %vm854_vm0, %v808_v60  ;;  %v2342_v62 = vld [vmem:[%s2963_s5] sm:$0xff]   ;;  %v2343_v63 = vld [vmem:[%s2963_s5 + $0x8] sm:$0xff]  }
 0x143   : > { %2179 = vmatprep.subr.bf16.mxu1 %v2342_v62 }
 0x144   : > { %v748_v2 = vadd.f32 %v2082_v1, %v2729_v37  ;;  %v795_v3 = vmax.f32 %v745_v0, 0.0  ;;  %v1945_v0 = vld [vmem:[%s2962_s4] ss:$0 sm:$0xff] }
 0x146   : > { %v796_v4 = vmax.f32 %v748_v2, 0.0  ;;  %v2083_v5 = vpop.f32.mrb[12].mxu0 }
 0x147   : > { %v2084_v6 = vpop.f32.mrb[13].mxu0 }
 0x148   : > { %v809_v7 = vpack.c.bf16 %v796_v4, %v795_v3  ;;  %v2085_v8 = vadd.f32 %v2084_v6, %v2083_v5  ;;  %v2086_v9 = vpop.f32.mrb[14].mxu0 }
 0x149   : > { %v2087_v10 = vpop.f32.mrb[15].mxu0 }
 0x14a   : > { %v753_v11 = vadd.f32 %v2085_v8, %v2729_v37  ;;  %v2088_v12 = vadd.f32 %v2087_v10, %v2086_v9  ;;  %2167 = vmatprep.mubr.msk.bf16.mxu0 %vm854_vm0, %v809_v7 }
 0x14c   : > { %v756_v13 = vadd.f32 %v2088_v12, %v2729_v37  ;;  %v797_v14 = vmax.f32 %v753_v11, 0.0 }
 0x14e   : > { %v798_v15 = vmax.f32 %v756_v13, 0.0  ;;  %v2089_v16 = vpop.f32.mrb[16].mxu0 }
 0x14f   : > { %v2090_v17 = vpop.f32.mrb[17].mxu0 }
 0x150   : > { %v810_v18 = vpack.c.bf16 %v798_v15, %v797_v14  ;;  %v2091_v19 = vadd.f32 %v2090_v17, %v2089_v16  ;;  %v2092_v20 = vpop.f32.mrb[18].mxu0  ;;  %v2345_v15 = vld [vmem:[%s2965_s7 + $0x8] sm:$0xff]  }
 0x151   : > { %v2093_v21 = vpop.f32.mrb[19].mxu0 }
 0x152   : > { %v761_v22 = vadd.f32 %v2091_v19, %v2729_v37  ;;  %v2094_v23 = vadd.f32 %v2093_v21, %v2092_v20  ;;  %2168 = vmatmul.mubr.msk.bf16.gmra.mrb[36].mxu0 %vm854_vm0, %v810_v18 }
 0x154   : > { %v764_v24 = vadd.f32 %v2094_v23, %v2729_v37  ;;  %v799_v25 = vmax.f32 %v761_v22, 0.0 }
 0x156   : > { %v800_v26 = vmax.f32 %v764_v24, 0.0  ;;  %v2095_v27 = vpop.f32.mrb[20].mxu0 }
 0x157   : > { %v2096_v28 = vpop.f32.mrb[21].mxu0 }
 0x158   : > { %v811_v29 = vpack.c.bf16 %v800_v26, %v799_v25  ;;  %v2097_v30 = vadd.f32 %v2096_v28, %v2095_v27  ;;  %v2098_v31 = vpop.f32.mrb[22].mxu0 }
 0x159   : > { %v2099_v32 = vpop.f32.mrb[23].mxu0 }
 0x15a   : > { %v769_v33 = vadd.f32 %v2097_v30, %v2729_v37  ;;  %v2100_v34 = vadd.f32 %v2099_v32, %v2098_v31  ;;  %2171 = vmatprep.mubr.msk.bf16.mxu0 %vm854_vm0, %v811_v29 }
 0x15c   : > { %v772_v35 = vadd.f32 %v2100_v34, %v2729_v37  ;;  %v801_v36 = vmax.f32 %v769_v33, 0.0 }
 0x15e   : > { %v802_v38 = vmax.f32 %v772_v35, 0.0  ;;  %v2101_v39 = vpop.f32.mrb[24].mxu0 }
 0x15f   : > { %v2102_v40 = vpop.f32.mrb[25].mxu0 }
 0x160   : > { %v812_v41 = vpack.c.bf16 %v802_v38, %v801_v36  ;;  %v2103_v42 = vadd.f32 %v2102_v40, %v2101_v39  ;;  %v2104_v43 = vpop.f32.mrb[26].mxu0 }
 0x161   : > { %v2105_v44 = vpop.f32.mrb[27].mxu0 }
 0x162   : > { %v777_v45 = vadd.f32 %v2103_v42, %v2729_v37  ;;  %v2106_v46 = vadd.f32 %v2105_v44, %v2104_v43  ;;  %2172 = vmatmul.mubr.msk.bf16.gmra.mrb[40].mxu0 %vm854_vm0, %v812_v41 }
 0x164   : > { %v780_v47 = vadd.f32 %v2106_v46, %v2729_v37  ;;  %v803_v48 = vmax.f32 %v777_v45, 0.0 }
 0x166   : > { %v804_v49 = vmax.f32 %v780_v47, 0.0  ;;  %v2107_v50 = vpop.f32.mrb[28].mxu0 }
 0x167   : > { %v2108_v51 = vpop.f32.mrb[29].mxu0 }
 0x168   : > { %v2109_v52 = vadd.f32 %v2108_v51, %v2107_v50  ;;  %v2110_v53 = vpop.f32.mrb[30].mxu0  ;;  %v813_v54 = vpack.c.bf16 %v804_v49, %v803_v48 }
 0x169   : > { %v2111_v55 = vpop.f32.mrb[31].mxu0 }
 0x16a   : > { %v785_v56 = vadd.f32 %v2109_v52, %v2729_v37  ;;  %v2112_v57 = vadd.f32 %v2111_v55, %v2110_v53  ;;  %2175 = vmatprep.mubr.msk.bf16.mxu1 %vm854_vm0, %v813_v54 }
 0x16c   : > { %v788_v58 = vadd.f32 %v2112_v57, %v2729_v37  ;;  %v805_v59 = vmax.f32 %v785_v56, 0.0  ;;  %v2344_v37 = vld [vmem:[%s2965_s7] sm:$0xff]  }
 0x16e   : > { %v806_v60 = vmax.f32 %v788_v58, 0.0 }
 0x170   : > { %v814_v61 = vpack.c.bf16 %v806_v60, %v805_v59  ;;  %v2346_v59 = vld [vmem:[%s2967_s9] sm:$0xff]   ;;  %v2347_v60 = vld [vmem:[%s2967_s9 + $0x8] sm:$0xff]  }
 0x171   : > { %2219 = vmatprep.subr.bf16.mxu0 %v2346_v59 }
 0x172   : > { %2176 = vmatmul.mubr.msk.bf16.vlgmr.msra.gmra.mrb[0].mxu1 %vm854_vm0, %v814_v61  ;;  %2220 = vmatpush3.bf16.msra.mxu0 %v2346_v59  ;;  %v1958_v61 = vld [vmem:[%s2964_s6] ss:$0 sm:$0xff] }
 0x173   : > { %2180 = vmatpush3.bf16.msra.mxu1 %v2342_v62  ;;  %2221 = vmatprep.subr.bf16.mxu0 %v2347_v60  ;;  %v2354_v59 = vld [vmem:[%s2969_s11 + $0x20] ss:$8 sps:$4 sm:$0xff]  }
 0x174   : > { %2181 = vmatprep.subr.bf16.mxu1 %v2343_v63 }
 0x176   : > { %2222 = vmatpush3.bf16.msra.mxu0 %v2347_v60  ;;  %v1969_v60 = vld [vmem:[%s2966_s8] ss:$0 sm:$0xff] }
 0x177   : > { %2182 = vmatpush3.bf16.msra.mxu1 %v2343_v63 }
 0x178   : > { %2199 = vmatprep.subr.bf16.mxu1 %v2344_v37 }
 0x215   : > { %v2165_v1 = vpop.f32.mrb[32].mxu0 }
 0x216   : > { %v922_v2 = vadd.f32 %v2165_v1, %v1945_v0  ;;  %v913_v3 = vpop.f32.mrb[33].mxu0 }
 0x217   : > { %v914_v4 = vadd.f32 %v1945_v0, %v913_v3  ;;  %v2166_v5 = vpop.f32.mrb[34].mxu0 }
 0x218   : > { %v925_v6 = vadd.f32 %v2166_v5, %v1945_v0  ;;  %v916_v7 = vpop.f32.mrb[35].mxu0  ;;  %v978_v9 = vmax.f32 %v922_v2, 0.0 }
 0x219   : > { %v917_v8 = vadd.f32 %v1945_v0, %v916_v7  ;;  %v976_v11 = vmax.f32 %v914_v4, 0.0 }
 0x21a   : > { %v979_v10 = vmax.f32 %v925_v6, 0.0 }
 0x21b   : > { %v977_v12 = vmax.f32 %v917_v8, 0.0 }
 0x21c   : > { %v993_v13 = vpack.c.bf16 %v979_v10, %v978_v9 }
 0x21d   : > { %v992_v14 = vpack.c.bf16 %v977_v12, %v976_v11 }
 0x21f   : > { %2183 = vmatprep.mubr.msk.bf16.mxu1 %vm1023_vm1, %v992_v14 }
 0x220   : > { %2184 = vmatmul.mubr.msk.bf16.vlgmr.msra.gmra.mrb[4].mxu1 %vm1023_vm1, %v993_v13 }
 0x221   : > { %2200 = vmatpush3.bf16.msra.mxu1 %v2344_v37 }
 0x222   : > { %2201 = vmatprep.subr.bf16.mxu1 %v2345_v15 }
 0x225   : > { %v2169_v16 = vpop.f32.mrb[36].mxu0  ;;  %2202 = vmatpush3.bf16.msra.mxu1 %v2345_v15 }
 0x226   : > { %v938_v17 = vadd.f32 %v2169_v16, %v1945_v0  ;;  %v929_v18 = vpop.f32.mrb[37].mxu0 }
 0x227   : > { %v930_v19 = vadd.f32 %v1945_v0, %v929_v18  ;;  %v2170_v20 = vpop.f32.mrb[38].mxu0 }
 0x228   : > { %v941_v21 = vadd.f32 %v2170_v20, %v1945_v0  ;;  %v932_v22 = vpop.f32.mrb[39].mxu0  ;;  %v982_v24 = vmax.f32 %v938_v17, 0.0 }
 0x229   : > { %v933_v23 = vadd.f32 %v1945_v0, %v932_v22  ;;  %v980_v26 = vmax.f32 %v930_v19, 0.0 }
 0x22a   : > { %v983_v25 = vmax.f32 %v941_v21, 0.0 }
 0x22b   : > { %v981_v27 = vmax.f32 %v933_v23, 0.0 }
 0x22c   : > { %v995_v28 = vpack.c.bf16 %v983_v25, %v982_v24 }
 0x22d   : > { %v994_v29 = vpack.c.bf16 %v981_v27, %v980_v26 }
 0x22f   : > { %2187 = vmatprep.mubr.msk.bf16.mxu1 %vm1023_vm1, %v994_v29 }
 0x230   : > { %2188 = vmatmul.mubr.msk.bf16.gmra.mrb[8].mxu1 %vm1023_vm1, %v995_v28 }
 0x235   : > { %v2173_v30 = vpop.f32.mrb[40].mxu0 }
 0x236   : > { %v954_v31 = vadd.f32 %v2173_v30, %v1945_v0  ;;  %v945_v32 = vpop.f32.mrb[41].mxu0 }
 0x237   : > { %v946_v33 = vadd.f32 %v1945_v0, %v945_v32  ;;  %v2174_v34 = vpop.f32.mrb[42].mxu0 }
 0x238   : > { %v957_v35 = vadd.f32 %v2174_v34, %v1945_v0  ;;  %v948_v36 = vpop.f32.mrb[43].mxu0  ;;  %v986_v39 = vmax.f32 %v954_v31, 0.0 }
 0x239   : > { %v949_v38 = vadd.f32 %v1945_v0, %v948_v36  ;;  %v984_v41 = vmax.f32 %v946_v33, 0.0 }
 0x23a   : > { %v987_v40 = vmax.f32 %v957_v35, 0.0 }
 0x23b   : > { %v985_v42 = vmax.f32 %v949_v38, 0.0 }
 0x23c   : > { %v997_v43 = vpack.c.bf16 %v987_v40, %v986_v39 }
 0x23d   : > { %v996_v44 = vpack.c.bf16 %v985_v42, %v984_v41 }
 0x23f   : > { %2191 = vmatprep.mubr.msk.bf16.mxu1 %vm1023_vm1, %v996_v44 }
 0x240   : > { %2192 = vmatmul.mubr.msk.bf16.gmra.mrb[12].mxu1 %vm1023_vm1, %v997_v43 }
 0x245   : > { %v2177_v45 = vpop.f32.mrb[0].mxu1 }
 0x246   : > { %v970_v46 = vadd.f32 %v2177_v45, %v1945_v0  ;;  %v961_v47 = vpop.f32.mrb[1].mxu1 }
 0x247   : > { %v962_v48 = vadd.f32 %v1945_v0, %v961_v47  ;;  %v2178_v49 = vpop.f32.mrb[2].mxu1 }
 0x248   : > { %v973_v50 = vadd.f32 %v2178_v49, %v1945_v0  ;;  %v964_v51 = vpop.f32.mrb[3].mxu1  ;;  %v990_v53 = vmax.f32 %v970_v46, 0.0 }
 0x249   : > { %v965_v52 = vadd.f32 %v1945_v0, %v964_v51  ;;  %v988_v55 = vmax.f32 %v962_v48, 0.0 }
 0x24a   : > { %v991_v54 = vmax.f32 %v973_v50, 0.0 }
 0x24b   : > { %v989_v56 = vmax.f32 %v965_v52, 0.0 }
 0x24c   : > { %v999_v57 = vpack.c.bf16 %v991_v54, %v990_v53  ;;  %v2348_v54 = vld [vmem:[%s2969_s11] ss:$8 sps:$4 sm:$0xff]  }
 0x24d   : > { %v998_v58 = vpack.c.bf16 %v989_v56, %v988_v55  ;;  %v2350_v55 = vld [vmem:[%s2969_s11 + $0x4] ss:$8 sps:$4 sm:$0xff]   ;;  %v2353_v56 = vld [vmem:[%s2969_s11 + $0x14] ss:$8 sps:$4 sm:$0xff]  }
 0x24e   : > { %1589 = vmatprep.subr.bf16.mxu1 %v2350_v55  ;;  %v2461_v55 = vmov 0  }
 0x24f   : > { %2195 = vmatprep.mubr.msk.bf16.mxu1 %vm1023_vm1, %v998_v58  ;;  %v2356_v58 = vld [vmem:[%s2969_s11 + $0x24] ss:$8 sps:$4 sm:$0xff]  }
 0x250   : > { %2196 = vmatmul.mubr.msk.bf16.gmra.mrb[16].mxu1 %vm1023_vm1, %v999_v57  ;;  %v2351_v57 = vld [vmem:[%s2969_s11 + $0x10] ss:$8 sps:$4 sm:$0xff]  }
 0x2f3   : > { %v2185_v62 = vpop.f32.mrb[4].mxu1 }
 0x2f4   : > { %v1091_v63 = vadd.f32 %v2185_v62, %v1958_v61  ;;  %v1082_v37 = vpop.f32.mrb[5].mxu1 }
 0x2f5   : > { %v1083_v0 = vadd.f32 %v1958_v61, %v1082_v37  ;;  %v2186_v1 = vpop.f32.mrb[6].mxu1 }
 0x2f6   : > { %v1094_v2 = vadd.f32 %v2186_v1, %v1958_v61  ;;  %v1085_v3 = vpop.f32.mrb[7].mxu1  ;;  %v1147_v5 = vmax.f32 %v1091_v63, 0.0 }
 0x2f7   : > { %v1086_v4 = vadd.f32 %v1958_v61, %v1085_v3  ;;  %v1145_v7 = vmax.f32 %v1083_v0, 0.0 }
 0x2f8   : > { %v1148_v6 = vmax.f32 %v1094_v2, 0.0 }
 0x2f9   : > { %v1146_v8 = vmax.f32 %v1086_v4, 0.0 }
 0x2fa   : > { %v1162_v9 = vpack.c.bf16 %v1148_v6, %v1147_v5 }
 0x2fb   : > { %v1161_v10 = vpack.c.bf16 %v1146_v8, %v1145_v7 }
 0x2fd   : > { %2203 = vmatprep.mubr.msk.bf16.mxu1 %vm1023_vm1, %v1161_v10 }
 0x2fe   : > { %2204 = vmatmul.mubr.msk.bf16.vlgmr.msra.gmra.mrb[20].mxu1 %vm1023_vm1, %v1162_v9 }
 0x2ff   : > { %1590 = vmatpush1.bf16.msra.mxu1 %v2348_v54  ;;  %v2359_v54 = vld [vmem:[%s2969_s11 + $0x34] ss:$8 sps:$4 sm:$0xff]  }
 0x300   : > { %1591 = vmatprep.subr.bf16.mxu1 %v2353_v56  ;;  %v1980_v56 = vld [vmem:[%s2968_s10] ss:$0 sm:$0xff] }
 0x303   : > { %v2189_v11 = vpop.f32.mrb[8].mxu1  ;;  %1592 = vmatpush1.bf16.msra.mxu1 %v2351_v57 }
 0x304   : > { %v1107_v12 = vadd.f32 %v2189_v11, %v1958_v61  ;;  %v1098_v13 = vpop.f32.mrb[9].mxu1  ;;  %1593 = vmatprep.subr.bf16.mxu1 %v2356_v58 }
 0x305   : > { %v1099_v14 = vadd.f32 %v1958_v61, %v1098_v13  ;;  %v2190_v15 = vpop.f32.mrb[10].mxu1 }
 0x306   : > { %v1110_v16 = vadd.f32 %v2190_v15, %v1958_v61  ;;  %v1101_v17 = vpop.f32.mrb[11].mxu1  ;;  %v1151_v19 = vmax.f32 %v1107_v12, 0.0 }
 0x307   : > { %v1102_v18 = vadd.f32 %v1958_v61, %v1101_v17  ;;  %v1149_v21 = vmax.f32 %v1099_v14, 0.0  ;;  %1594 = vmatpush1.bf16.msra.mxu1 %v2354_v59 }
 0x308   : > { %v1152_v20 = vmax.f32 %v1110_v16, 0.0  ;;  %1595 = vmatprep.subr.bf16.mxu1 %v2359_v54 }
 0x309   : > { %v1150_v22 = vmax.f32 %v1102_v18, 0.0 }
 0x30a   : > { %v1164_v23 = vpack.c.bf16 %v1152_v20, %v1151_v19 }
 0x30b   : > { %v1163_v24 = vpack.c.bf16 %v1150_v22, %v1149_v21 }
 0x30d   : > { %2207 = vmatprep.mubr.msk.bf16.mxu1 %vm1023_vm1, %v1163_v24 }
 0x30e   : > { %2208 = vmatmul.mubr.msk.bf16.gmra.mrb[24].mxu1 %vm1023_vm1, %v1164_v23 }
 0x313   : > { %v2193_v25 = vpop.f32.mrb[12].mxu1 }
 0x314   : > { %v1123_v26 = vadd.f32 %v2193_v25, %v1958_v61  ;;  %v1114_v27 = vpop.f32.mrb[13].mxu1 }
 0x315   : > { %v1115_v28 = vadd.f32 %v1958_v61, %v1114_v27  ;;  %v2194_v29 = vpop.f32.mrb[14].mxu1 }
 0x316   : > { %v1126_v30 = vadd.f32 %v2194_v29, %v1958_v61  ;;  %v1117_v31 = vpop.f32.mrb[15].mxu1  ;;  %v1155_v33 = vmax.f32 %v1123_v26, 0.0 }
 0x317   : > { %v1118_v32 = vadd.f32 %v1958_v61, %v1117_v31  ;;  %v1153_v35 = vmax.f32 %v1115_v28, 0.0 }
 0x318   : > { %v1156_v34 = vmax.f32 %v1126_v30, 0.0 }
 0x319   : > { %v1154_v36 = vmax.f32 %v1118_v32, 0.0 }
 0x31a   : > { %v1166_v38 = vpack.c.bf16 %v1156_v34, %v1155_v33 }
 0x31b   : > { %v1165_v39 = vpack.c.bf16 %v1154_v36, %v1153_v35 }
 0x31d   : > { %2211 = vmatprep.mubr.msk.bf16.mxu1 %vm1023_vm1, %v1165_v39 }
 0x31e   : > { %2212 = vmatmul.mubr.msk.bf16.gmra.mrb[28].mxu1 %vm1023_vm1, %v1166_v38 }
 0x323   : > { %v2197_v40 = vpop.f32.mrb[16].mxu1 }
 0x324   : > { %v1139_v41 = vadd.f32 %v2197_v40, %v1958_v61  ;;  %v1130_v42 = vpop.f32.mrb[17].mxu1 }
 0x325   : > { %v1131_v43 = vadd.f32 %v1958_v61, %v1130_v42  ;;  %v2198_v44 = vpop.f32.mrb[18].mxu1 }
 0x326   : > { %v1142_v45 = vadd.f32 %v2198_v44, %v1958_v61  ;;  %v1133_v46 = vpop.f32.mrb[19].mxu1  ;;  %v1159_v48 = vmax.f32 %v1139_v41, 0.0 }
 0x327   : > { %v1134_v47 = vadd.f32 %v1958_v61, %v1133_v46  ;;  %v1157_v50 = vmax.f32 %v1131_v43, 0.0 }
 0x328   : > { %v1160_v49 = vmax.f32 %v1142_v45, 0.0 }
 0x329   : > { %v1158_v51 = vmax.f32 %v1134_v47, 0.0 }
 0x32a   : > { %v1168_v52 = vpack.c.bf16 %v1160_v49, %v1159_v48 }
 0x32b   : > { %v1167_v53 = vpack.c.bf16 %v1158_v51, %v1157_v50 }
 0x32d   : > { %2215 = vmatprep.mubr.msk.bf16.mxu1 %vm1023_vm1, %v1167_v53  ;;  %v2357_v53 = vld [vmem:[%s2969_s11 + $0x30] ss:$8 sps:$4 sm:$0xff]  }
 0x32e   : > { %2216 = vmatmul.mubr.msk.bf16.gmra.mrb[32].mxu1 %vm1023_vm1, %v1168_v52 }
 0x32f   : > { %1596 = vmatpush1.bf16.msra.mxu1 %v2357_v53  ;;  %1621 = vmatprep.mubr.bf16.mxu1 %v2461_v55 }
 0x3d1   : > { %v2205_v61 = vpop.f32.mrb[20].mxu1 }
 0x3d2   : > { %v1259_v62 = vadd.f32 %v2205_v61, %v1969_v60  ;;  %v1250_v63 = vpop.f32.mrb[21].mxu1 }
 0x3d3   : > { %v1251_v37 = vadd.f32 %v1969_v60, %v1250_v63  ;;  %v2206_v0 = vpop.f32.mrb[22].mxu1 }
 0x3d4   : > { %v1262_v1 = vadd.f32 %v2206_v0, %v1969_v60  ;;  %v1253_v2 = vpop.f32.mrb[23].mxu1  ;;  %v1315_v4 = vmax.f32 %v1259_v62, 0.0 }
 0x3d5   : > { %v1254_v3 = vadd.f32 %v1969_v60, %v1253_v2  ;;  %v1313_v6 = vmax.f32 %v1251_v37, 0.0 }
 0x3d6   : > { %v1316_v5 = vmax.f32 %v1262_v1, 0.0 }
 0x3d7   : > { %v1314_v7 = vmax.f32 %v1254_v3, 0.0 }
 0x3d8   : > { %v1330_v8 = vpack.c.bf16 %v1316_v5, %v1315_v4 }
 0x3d9   : > { %v1329_v9 = vpack.c.bf16 %v1314_v7, %v1313_v6 }
 0x3db   : > { %2223 = vmatprep.mubr.msk.bf16.mxu0 %vm1023_vm1, %v1329_v9 }
 0x3dc   : > { %2224 = vmatmul.mubr.msk.bf16.vlgmr.msra.gmra.mrb[44].mxu0 %vm1023_vm1, %v1330_v8 }
 0x3e1   : > { %v2209_v10 = vpop.f32.mrb[24].mxu1 }
 0x3e2   : > { %v1275_v11 = vadd.f32 %v2209_v10, %v1969_v60  ;;  %v1266_v12 = vpop.f32.mrb[25].mxu1 }
 0x3e3   : > { %v1267_v13 = vadd.f32 %v1969_v60, %v1266_v12  ;;  %v2210_v14 = vpop.f32.mrb[26].mxu1 }
 0x3e4   : > { %v1278_v15 = vadd.f32 %v2210_v14, %v1969_v60  ;;  %v1269_v16 = vpop.f32.mrb[27].mxu1  ;;  %v1319_v18 = vmax.f32 %v1275_v11, 0.0 }
 0x3e5   : > { %v1270_v17 = vadd.f32 %v1969_v60, %v1269_v16  ;;  %v1317_v20 = vmax.f32 %v1267_v13, 0.0 }
 0x3e6   : > { %v1320_v19 = vmax.f32 %v1278_v15, 0.0 }
 0x3e7   : > { %v1318_v21 = vmax.f32 %v1270_v17, 0.0 }
 0x3e8   : > { %v1332_v22 = vpack.c.bf16 %v1320_v19, %v1319_v18 }
 0x3e9   : > { %v1331_v23 = vpack.c.bf16 %v1318_v21, %v1317_v20 }
 0x3eb   : > { %2227 = vmatprep.mubr.msk.bf16.mxu0 %vm1023_vm1, %v1331_v23 }
 0x3ec   : > { %2228 = vmatmul.mubr.msk.bf16.gmra.mrb[48].mxu0 %vm1023_vm1, %v1332_v22 }
 0x3f1   : > { %v2213_v24 = vpop.f32.mrb[28].mxu1 }
 0x3f2   : > { %v1291_v25 = vadd.f32 %v2213_v24, %v1969_v60  ;;  %v1282_v26 = vpop.f32.mrb[29].mxu1 }
 0x3f3   : > { %v1283_v27 = vadd.f32 %v1969_v60, %v1282_v26  ;;  %v2214_v28 = vpop.f32.mrb[30].mxu1 }
 0x3f4   : > { %v1294_v29 = vadd.f32 %v2214_v28, %v1969_v60  ;;  %v1285_v30 = vpop.f32.mrb[31].mxu1  ;;  %v1323_v32 = vmax.f32 %v1291_v25, 0.0 }
 0x3f5   : > { %v1286_v31 = vadd.f32 %v1969_v60, %v1285_v30  ;;  %v1321_v34 = vmax.f32 %v1283_v27, 0.0 }
 0x3f6   : > { %v1324_v33 = vmax.f32 %v1294_v29, 0.0 }
 0x3f7   : > { %v1322_v35 = vmax.f32 %v1286_v31, 0.0 }
 0x3f8   : > { %v1334_v36 = vpack.c.bf16 %v1324_v33, %v1323_v32 }
 0x3f9   : > { %v1333_v38 = vpack.c.bf16 %v1322_v35, %v1321_v34 }
 0x3fb   : > { %2231 = vmatprep.mubr.msk.bf16.mxu0 %vm1023_vm1, %v1333_v38 }
 0x3fc   : > { %2232 = vmatmul.mubr.msk.bf16.gmra.mrb[52].mxu0 %vm1023_vm1, %v1334_v36 }
 0x401   : > { %v2217_v39 = vpop.f32.mrb[32].mxu1 }
 0x402   : > { %v1307_v40 = vadd.f32 %v2217_v39, %v1969_v60  ;;  %v1298_v41 = vpop.f32.mrb[33].mxu1 }
 0x403   : > { %v1299_v42 = vadd.f32 %v1969_v60, %v1298_v41  ;;  %v2218_v43 = vpop.f32.mrb[34].mxu1 }
 0x404   : > { %v1310_v44 = vadd.f32 %v2218_v43, %v1969_v60  ;;  %v1301_v45 = vpop.f32.mrb[35].mxu1  ;;  %v1327_v47 = vmax.f32 %v1307_v40, 0.0 }
 0x405   : > { %v1302_v46 = vadd.f32 %v1969_v60, %v1301_v45  ;;  %v1325_v49 = vmax.f32 %v1299_v42, 0.0 }
 0x406   : > { %v1328_v48 = vmax.f32 %v1310_v44, 0.0 }
 0x407   : > { %v1326_v50 = vmax.f32 %v1302_v46, 0.0 }
 0x408   : > { %v1336_v51 = vpack.c.bf16 %v1328_v48, %v1327_v47 }
 0x409   : > { %v1335_v52 = vpack.c.bf16 %v1326_v50, %v1325_v49  ;;  %v1515_v49 = vlaneseq }
 0x40b   : > { %2235 = vmatprep.mubr.msk.bf16.mxu0 %vm1023_vm1, %v1335_v52  ;;  %v1516_v50 = vshrl.u32 %v1515_v49, 7  ;;  %v1513_v52 = vld [vmem:[%s2970_s12] sm:$0x3] }
 0x40c   : > { %2236 = vmatmul.mubr.msk.bf16.gmra.mrb[56].mxu0 %vm1023_vm1, %v1336_v51 }
 0x40d   : > { %v1517_v51 = vsub.s32 0, %v1516_v50  ;;  %v1521_v53 = vsub.s32 1, %v1516_v50 }
 0x40f   : > { %v2852_v54 = vrot.slane %v1513_v52, %v1517_v51 }
 0x4af   : > { %v2225_v57 = vpop.f32.mrb[44].mxu0 }
 0x4b0   : > { %v1427_v58 = vadd.f32 %v2225_v57, %v1980_v56  ;;  %v1418_v59 = vpop.f32.mrb[45].mxu0 }
 0x4b1   : > { %v1419_v60 = vadd.f32 %v1980_v56, %v1418_v59  ;;  %v2226_v61 = vpop.f32.mrb[46].mxu0 }
 0x4b2   : > { %v1430_v62 = vadd.f32 %v2226_v61, %v1980_v56  ;;  %v1421_v63 = vpop.f32.mrb[47].mxu0  ;;  %v1483_v0 = vmax.f32 %v1427_v58, 0.0 }
 0x4b3   : > { %v1422_v37 = vadd.f32 %v1980_v56, %v1421_v63  ;;  %v1481_v2 = vmax.f32 %v1419_v60, 0.0 }
 0x4b4   : > { %v1484_v1 = vmax.f32 %v1430_v62, 0.0 }
 0x4b5   : > { %v1482_v3 = vmax.f32 %v1422_v37, 0.0 }
 0x4b6   : > { %v1498_v4 = vpack.c.bf16 %v1484_v1, %v1483_v0 }
 0x4b7   : > { %v1497_v5 = vpack.c.bf16 %v1482_v3, %v1481_v2 }
 0x4b9   : > { %1999 = vmatmul.mubr.msk.bf16.vlgmr.msra.gmra.mrb[36].mxu1 %vm854_vm0, %v1497_v5 }
 0x4ba   : > { %1631 = vmatprep.mubr.bf16.mxu1 %v2461_v55 }
 0x4bf   : > { %v2229_v6 = vpop.f32.mrb[48].mxu0 }
 0x4c0   : > { %v1443_v7 = vadd.f32 %v2229_v6, %v1980_v56  ;;  %v1434_v8 = vpop.f32.mrb[49].mxu0 }
 0x4c1   : > { %v1435_v9 = vadd.f32 %v1980_v56, %v1434_v8  ;;  %v2230_v10 = vpop.f32.mrb[50].mxu0  ;;  %2000 = vmatmul.mubr.msk.bf16.gmra.mrb[40].mxu1 %vm854_vm0, %v1498_v4 }
 0x4c2   : > { %v1446_v11 = vadd.f32 %v2230_v10, %v1980_v56  ;;  %v1437_v12 = vpop.f32.mrb[51].mxu0  ;;  %1641 = vmatprep.mubr.bf16.mxu1 %v2461_v55  ;;  %v1487_v14 = vmax.f32 %v1443_v7, 0.0 }
 0x4c3   : > { %v1438_v13 = vadd.f32 %v1980_v56, %v1437_v12  ;;  %v1485_v16 = vmax.f32 %v1435_v9, 0.0 }
 0x4c4   : > { %v1488_v15 = vmax.f32 %v1446_v11, 0.0 }
 0x4c5   : > { %v1486_v17 = vmax.f32 %v1438_v13, 0.0 }
 0x4c6   : > { %v1500_v18 = vpack.c.bf16 %v1488_v15, %v1487_v14 }
 0x4c7   : > { %v1499_v19 = vpack.c.bf16 %v1486_v17, %v1485_v16 }
 0x4c9   : > { %2001 = vmatmul.mubr.msk.bf16.gmra.mrb[44].mxu1 %vm854_vm0, %v1499_v19 }
 0x4ca   : > { %1651 = vmatprep.mubr.bf16.mxu1 %v2461_v55 }
 0x4cf   : > { %v2233_v20 = vpop.f32.mrb[52].mxu0 }
 0x4d0   : > { %v1459_v21 = vadd.f32 %v2233_v20, %v1980_v56  ;;  %v1450_v22 = vpop.f32.mrb[53].mxu0 }
 0x4d1   : > { %v1451_v23 = vadd.f32 %v1980_v56, %v1450_v22  ;;  %v2234_v24 = vpop.f32.mrb[54].mxu0  ;;  %2002 = vmatmul.mubr.msk.bf16.gmra.mrb[48].mxu1 %vm854_vm0, %v1500_v18 }
 0x4d2   : > { %v1462_v25 = vadd.f32 %v2234_v24, %v1980_v56  ;;  %v1453_v26 = vpop.f32.mrb[55].mxu0  ;;  %1661 = vmatprep.mubr.bf16.mxu1 %v2461_v55  ;;  %v1491_v28 = vmax.f32 %v1459_v21, 0.0 }
 0x4d3   : > { %v1454_v27 = vadd.f32 %v1980_v56, %v1453_v26  ;;  %v1489_v30 = vmax.f32 %v1451_v23, 0.0 }
 0x4d4   : > { %v1492_v29 = vmax.f32 %v1462_v25, 0.0 }
 0x4d5   : > { %v1490_v31 = vmax.f32 %v1454_v27, 0.0 }
 0x4d6   : > { %v1502_v32 = vpack.c.bf16 %v1492_v29, %v1491_v28 }
 0x4d7   : > { %v1501_v33 = vpack.c.bf16 %v1490_v31, %v1489_v30 }
 0x4d9   : > { %2003 = vmatmul.mubr.msk.bf16.gmra.mrb[52].mxu1 %vm854_vm0, %v1501_v33 }
 0x4da   : > { %1671 = vmatprep.mubr.bf16.mxu1 %v2461_v55 }
 0x4df   : > { %v2237_v34 = vpop.f32.mrb[56].mxu0 }
 0x4e0   : > { %v1475_v35 = vadd.f32 %v2237_v34, %v1980_v56  ;;  %v1466_v36 = vpop.f32.mrb[57].mxu0 }
 0x4e1   : > { %v1467_v38 = vadd.f32 %v1980_v56, %v1466_v36  ;;  %v2238_v39 = vpop.f32.mrb[58].mxu0  ;;  %2004 = vmatmul.mubr.msk.bf16.gmra.mrb[56].mxu1 %vm854_vm0, %v1502_v32 }
 0x4e2   : > { %v1478_v40 = vadd.f32 %v2238_v39, %v1980_v56  ;;  %v1469_v41 = vpop.f32.mrb[59].mxu0  ;;  %1681 = vmatprep.mubr.bf16.mxu1 %v2461_v55  ;;  %v1495_v43 = vmax.f32 %v1475_v35, 0.0 }
 0x4e3   : > { %v1470_v42 = vadd.f32 %v1980_v56, %v1469_v41  ;;  %v1493_v45 = vmax.f32 %v1467_v38, 0.0  ;;  %v2854_v56 = vrot.slane %v1513_v52, %v1521_v53 }
 0x4e4   : > { %v1496_v44 = vmax.f32 %v1478_v40, 0.0 }
 0x4e5   : > { %v1494_v46 = vmax.f32 %v1470_v42, 0.0 }
 0x4e6   : > { %v1504_v47 = vpack.c.bf16 %v1496_v44, %v1495_v43 }
 0x4e7   : > { %v1503_v48 = vpack.c.bf16 %v1494_v46, %v1493_v45 }
 0x4e9   : > { %2005 = vmatmul.mubr.msk.bf16.gmra.mrb[60].mxu1 %vm854_vm0, %v1503_v48 }
 0x4ea   : > { %1691 = vmatprep.mubr.bf16.mxu1 %v2461_v55 }
 0x4f1   : > { %2006 = vmatmul.mubr.msk.bf16.gmra.mrb[64].mxu1 %vm854_vm0, %v1504_v47 }
 0x58c   : > { %v1623_v57 = vpop.f32.mrb[36].mxu1 }
 0x58d   : > { %v1624_v58 = vadd.f32 %v1623_v57, %v2852_v54  ;;  %v1625_v59 = vpop.f32.mrb[37].mxu1 }
 0x58e   : > { %v1626_v55 = vadd.f32 %v1625_v59, %v2854_v56  ;;  %v1627_v60 = vpop.f32.mrb[38].mxu1 }
 0x58f   : > { %v1628_v61 = vadd.f32 %v1627_v60, %v2852_v54  ;;  %v1629_v62 = vpop.f32.mrb[39].mxu1 }
 0x590   : > { %v2031_v63 = vpack.c.bf16 %v1626_v55, %v1624_v58  ;;  %v1630_v37 = vadd.f32 %v1629_v62, %v2854_v56 }
 0x592   : > { %1798 = vst [vmem:[%s2862_s24] sm:$0xff] %v2031_v63  ;;  %v2032_v0 = vpack.c.bf16 %v1630_v37, %v1628_v61 }
 0x594   : > { %1799 = vst [vmem:[%s2862_s24 + $0x8] sm:$0xff] %v2032_v0  ;;  %v1633_v1 = vpop.f32.mrb[40].mxu1 }
 0x595   : > { %v1634_v2 = vadd.f32 %v1633_v1, %v2852_v54  ;;  %v1635_v3 = vpop.f32.mrb[41].mxu1 }
 0x596   : > { %v1636_v4 = vadd.f32 %v1635_v3, %v2854_v56  ;;  %v1637_v5 = vpop.f32.mrb[42].mxu1 }
 0x597   : > { %v1638_v6 = vadd.f32 %v1637_v5, %v2852_v54  ;;  %v1639_v7 = vpop.f32.mrb[43].mxu1 }
 0x598   : > { %v2033_v8 = vpack.c.bf16 %v1636_v4, %v1634_v2  ;;  %v1640_v9 = vadd.f32 %v1639_v7, %v2854_v56 }
 0x59a   : > { %1800 = vst [vmem:[%s2862_s24 + $0x10] sm:$0xff] %v2033_v8  ;;  %v2034_v10 = vpack.c.bf16 %v1640_v9, %v1638_v6 }
 0x59c   : > { %1801 = vst [vmem:[%s2862_s24 + $0x18] sm:$0xff] %v2034_v10  ;;  %v1643_v11 = vpop.f32.mrb[44].mxu1 }
 0x59d   : > { %v1644_v12 = vadd.f32 %v1643_v11, %v2852_v54  ;;  %v1645_v13 = vpop.f32.mrb[45].mxu1 }
 0x59e   : > { %v1646_v14 = vadd.f32 %v1645_v13, %v2854_v56  ;;  %v1647_v15 = vpop.f32.mrb[46].mxu1 }
 0x59f   : > { %v1648_v16 = vadd.f32 %v1647_v15, %v2852_v54  ;;  %v1649_v17 = vpop.f32.mrb[47].mxu1 }
 0x5a0   : > { %v2035_v18 = vpack.c.bf16 %v1646_v14, %v1644_v12  ;;  %v1650_v19 = vadd.f32 %v1649_v17, %v2854_v56 }
 0x5a2   : > { %1802 = vst [vmem:[%s2862_s24 + $0x20] sm:$0xff] %v2035_v18  ;;  %v2036_v20 = vpack.c.bf16 %v1650_v19, %v1648_v16 }
 0x5a4   : > { %1803 = vst [vmem:[%s2862_s24 + $0x28] sm:$0xff] %v2036_v20  ;;  %v1653_v21 = vpop.f32.mrb[48].mxu1 }
 0x5a5   : > { %v1654_v22 = vadd.f32 %v1653_v21, %v2852_v54  ;;  %v1655_v23 = vpop.f32.mrb[49].mxu1 }
 0x5a6   : > { %v1656_v24 = vadd.f32 %v1655_v23, %v2854_v56  ;;  %v1657_v25 = vpop.f32.mrb[50].mxu1 }
 0x5a7   : > { %v1658_v26 = vadd.f32 %v1657_v25, %v2852_v54  ;;  %v1659_v27 = vpop.f32.mrb[51].mxu1 }
 0x5a8   : > { %v2037_v28 = vpack.c.bf16 %v1656_v24, %v1654_v22  ;;  %v1660_v29 = vadd.f32 %v1659_v27, %v2854_v56 }
 0x5aa   : > { %1804 = vst [vmem:[%s2862_s24 + $0x30] sm:$0xff] %v2037_v28  ;;  %v2038_v30 = vpack.c.bf16 %v1660_v29, %v1658_v26 }
 0x5ac   : > { %1805 = vst [vmem:[%s2862_s24 + $0x38] sm:$0xff] %v2038_v30  ;;  %v1663_v31 = vpop.f32.mrb[52].mxu1 }
 0x5ad   : > { %v1664_v32 = vadd.f32 %v1663_v31, %v2852_v54  ;;  %v1665_v33 = vpop.f32.mrb[53].mxu1 }
 0x5ae   : > { %v1666_v34 = vadd.f32 %v1665_v33, %v2854_v56  ;;  %v1667_v35 = vpop.f32.mrb[54].mxu1 }
 0x5af   : > { %v1668_v36 = vadd.f32 %v1667_v35, %v2852_v54  ;;  %v1669_v38 = vpop.f32.mrb[55].mxu1 }
 0x5b0   : > { %v2039_v39 = vpack.c.bf16 %v1666_v34, %v1664_v32  ;;  %v1670_v40 = vadd.f32 %v1669_v38, %v2854_v56 }
 0x5b2   : > { %1806 = vst [vmem:[%s2862_s24 + $0x40] sm:$0xff] %v2039_v39  ;;  %v2040_v41 = vpack.c.bf16 %v1670_v40, %v1668_v36 }
 0x5b4   : > { %1807 = vst [vmem:[%s2862_s24 + $0x48] sm:$0xff] %v2040_v41  ;;  %v1673_v42 = vpop.f32.mrb[56].mxu1 }
 0x5b5   : > { %v1674_v43 = vadd.f32 %v1673_v42, %v2852_v54  ;;  %v1675_v44 = vpop.f32.mrb[57].mxu1 }
 0x5b6   : > { %v1676_v45 = vadd.f32 %v1675_v44, %v2854_v56  ;;  %v1677_v46 = vpop.f32.mrb[58].mxu1 }
 0x5b7   : > { %v1678_v47 = vadd.f32 %v1677_v46, %v2852_v54  ;;  %v1679_v48 = vpop.f32.mrb[59].mxu1 }
 0x5b8   : > { %v2041_v49 = vpack.c.bf16 %v1676_v45, %v1674_v43  ;;  %v1680_v50 = vadd.f32 %v1679_v48, %v2854_v56 }
 0x5ba   : > { %1808 = vst [vmem:[%s2862_s24 + $0x50] sm:$0xff] %v2041_v49  ;;  %v2042_v51 = vpack.c.bf16 %v1680_v50, %v1678_v47 }
 0x5bc   : > { %1809 = vst [vmem:[%s2862_s24 + $0x58] sm:$0xff] %v2042_v51  ;;  %v1683_v52 = vpop.f32.mrb[60].mxu1 }
 0x5bd   : > { %v1684_v53 = vadd.f32 %v1683_v52, %v2852_v54  ;;  %v1685_v57 = vpop.f32.mrb[61].mxu1 }
 0x5be   : > { %v1686_v58 = vadd.f32 %v1685_v57, %v2854_v56  ;;  %v1687_v59 = vpop.f32.mrb[62].mxu1 }
 0x5bf   : > { %v1688_v55 = vadd.f32 %v1687_v59, %v2852_v54  ;;  %v1689_v60 = vpop.f32.mrb[63].mxu1 }
 0x5c0   : > { %v2043_v61 = vpack.c.bf16 %v1686_v58, %v1684_v53  ;;  %v1690_v62 = vadd.f32 %v1689_v60, %v2854_v56 }
 0x5c2   : > { %1810 = vst [vmem:[%s2862_s24 + $0x60] sm:$0xff] %v2043_v61  ;;  %v2044_v63 = vpack.c.bf16 %v1690_v62, %v1688_v55 }
 0x5c4   : > { %1811 = vst [vmem:[%s2862_s24 + $0x68] sm:$0xff] %v2044_v63  ;;  %v1693_v37 = vpop.f32.mrb[64].mxu1 }
 0x5c5   : > { %v1694_v0 = vadd.f32 %v1693_v37, %v2852_v54  ;;  %v1695_v1 = vpop.f32.mrb[65].mxu1 }
 0x5c6   : > { %v1696_v2 = vadd.f32 %v1695_v1, %v2854_v56  ;;  %v1697_v3 = vpop.f32.mrb[66].mxu1 }
 0x5c7   : > { %v1698_v4 = vadd.f32 %v1697_v3, %v2852_v54  ;;  %v1699_v5 = vpop.f32.mrb[67].mxu1 }
 0x5c8   : > { %v2045_v6 = vpack.c.bf16 %v1696_v2, %v1694_v0  ;;  %v1700_v7 = vadd.f32 %v1699_v5, %v2854_v56 }
 0x5ca   : > { %1812 = vst [vmem:[%s2862_s24 + $0x70] sm:$0xff] %v2045_v6  ;;  %v2046_v8 = vpack.c.bf16 %v1700_v7, %v1698_v4 }
 0x5cc   : > { %1813 = vst [vmem:[%s2862_s24 + $0x78] sm:$0xff] %v2046_v8 }
 0x5cd   : > { %2403 = shalt.err (!%p2400_p1)
}
 0x5ce   : > { %s2404_s15 = scalar_lea.hbm %s2911_s18, 2048  ;;  %s2408_s25 = scalar_lea.hbm %s2971_s13, 8192 }
 0x5cf   : > { %p2405_p3 = scmp.ne.s32.totalorder %s2911_s18, %s2404_s15  ;;  %p2409_p0 = scmp.lt.u32.totalorder %s2911_s18, %s2971_s13 }
 0x5d0   : > { %p2410_p2 = scmp.lt.u32.totalorder %s2408_s25, %s2404_s15  ;;  %p2412_p6 = scmp.lt.u32.totalorder %s2404_s15, %s2911_s18 }
 0x5d1   : > { %p2406_p4 = pnand %p2405_p3, %p2988_p10 }
 0x5d2   : > { %p2411_p7 = por %p2410_p2, %p2409_p0 }
 0x5d3   : > { %p2407_p5 = pneg %p2406_p4 }
 0x5d4   : > { %p2413_p11 = por %p2412_p6, %p2411_p7 }
 0x5d6   : > { %p2414_p12 = pnand %p2413_p11, %p2407_p5 }
 0x5d8   : > { %2417 = shalt.err (!%p2414_p12)
}
 0x5d9   : > { %s2463_s14 = smov 128   ;;  %s2464_s16 = smov 8  }
 0x5da   : > { %2249 = dma.vmem_to_hbm [thread:$0]  (%p2988_p10), %s2913_s23, 2048, %s2911_s18, %s1815_s29, %s2463_s14, %s2463_s14, %s2464_s16  }
 0x5db PF: > { %s2989_s22 = sld [smem:[#allocation8_spill]]  ;;  %p2260_p8 = scmp.ge.s32.totalorder %s2456_s28, 2 }
 0x5dc   : > { %p2990_p9 = scmp.ne.s32.totalorder %s2985_s21, 0 }
 0x5de   : > { %p2256_p13 = pnand %p2260_p8, %p2990_p9 }
 0x5e1   : > { %s1844_s24 = sand.u32 1, %s2989_s22  }
 0x5e2   : > { %s1845_s15 = scalar_lea.sflag [#allocation4], %s1844_s24 }
 0x5e3   : > { %2439 = dma.done.wait (!%p2256_p13), %s1845_s15, 2048  }
 0x5e4   : > { %2441 = vsyncadd (!%p2256_p13), %s1845_s15, 4294965248  ;;  %s2991_s28 = sld [smem:[#allocation10_spill]]  ;;  %s2992_s19 = sld [smem:[#allocation9_spill]] }
 0x5e5   : > { %s2993_s27 = sld [smem:[#allocation11_spill]]  ;;  %s2994_s25 = smov %s2448_s26 }
 0x5ea   : > { %p26_p1 = scmp.ge.s32.totalorder %s2991_s28, 6   ;;  %s2995_s26 = smov %s2992_s19 }
 0x5ec   :  { %28 = sbr.rel (!%p26_p1) target bundleno = 5 (0x5), region = 117 }
 0x5f3   :  { %1850 = vsyncpa [#allocation3], 1 }
 0x5f4   :  { %1852 = vsyncpa [#allocation3 + $0x1], 1 }
 0x5f5   :  { %1853 = vsyncpa [#allocation4], 1 }
 0x5f6   :  { %1855 = vsyncpa [#allocation4 + $0x1], 1 }

</bundles_post_ra>
